<compile_context>
chip_gen: v7x
topology: tpu7x:2x2x1
jax: 0.10.0
libtpu: 0.0.40
codegen_flags: <defaults>
</compile_context>

<pallas_src>
import numpy as np
import jax
import jax.numpy as jnp
from jax.experimental import pallas as pl
from jax.experimental.pallas import tpu as pltpu

FILTER_LENGTH = 512
N_OVERLAP = 4
HOP = FILTER_LENGTH // N_OVERLAP          # 128 -> lane aligned
WIN_LENGTH = 512
CUTOFF = FILTER_LENGTH // 2 + 1           # 257
CPAD = ((CUTOFF + 127) // 128) * 128      # 384, lane-aligned padded cutoff
TINY_F32 = float(np.finfo(np.float32).tiny)


# ---------------------------------------------------------------------------
# Constant STFT bases / window sums (host glue; mirrors torch-stft STFT.__init__)
# ---------------------------------------------------------------------------
def _periodic_hann(n):
    return 0.5 - 0.5 * np.cos(2.0 * np.pi * np.arange(n) / n)


def _stft_bases():
    L = FILTER_LENGTH
    fourier = np.fft.fft(np.eye(L))
    fb = np.vstack([np.real(fourier[:CUTOFF, :]), np.imag(fourier[:CUTOFF, :])])
    scale = L / HOP
    inv = np.linalg.pinv(scale * fb).T                     # (2*CUTOFF, L)
    win = _periodic_hann(WIN_LENGTH)
    pad = (L - WIN_LENGTH) // 2
    win = np.pad(win, (pad, L - WIN_LENGTH - pad))
    fwd = (fb * win[None, :]).astype(np.float32)           # windowed forward basis
    invb = (inv * win[None, :]).astype(np.float32)         # windowed inverse basis
    return fwd, invb


def _fused_bases():
    """Lane-padded forward basis + split cos/sin inverse bases."""
    fwd, invb = _stft_bases()                              # each (2*CUTOFF, L)
    L = FILTER_LENGTH
    w_fwd = np.zeros((L, 2 * CPAD), np.float32)
    w_fwd[:, :CUTOFF] = fwd[:CUTOFF, :].T                  # real forward basis^T
    w_fwd[:, CPAD:CPAD + CUTOFF] = fwd[CUTOFF:, :].T       # imag forward basis^T
    w_cos = np.zeros((CPAD, L), np.float32)
    w_sin = np.zeros((CPAD, L), np.float32)
    w_cos[:CUTOFF, :] = invb[:CUTOFF, :]                   # cos rows
    w_sin[:CUTOFF, :] = invb[CUTOFF:, :]                   # sin rows
    return w_fwd, w_cos, w_sin


def _window_sumsquare(n_frames):
    L = FILTER_LENGTH
    n = L + HOP * (n_frames - 1)
    win = _periodic_hann(WIN_LENGTH)
    pad = (L - WIN_LENGTH) // 2
    win_sq = np.pad(win, (pad, L - WIN_LENGTH - pad)) ** 2
    x = np.zeros(n, dtype=np.float64)
    for i in range(n_frames):
        s = i * HOP
        x[s:min(n, s + L)] += win_sq[:max(0, min(L, n - s))]
    return x.astype(np.float32)


def _gain(n_frames):
    """Precomputed epilogue gain: (1/wsum where nonzero else 1) * L/HOP."""
    out_rows = n_frames + N_OVERLAP - 1
    wsum = _window_sumsquare(n_frames)                     # (out_rows * HOP,)
    g = np.where(wsum > TINY_F32, 1.0 / np.maximum(wsum, TINY_F32), 1.0)
    g = g * (FILTER_LENGTH / HOP)
    return g.astype(np.float32).reshape(out_rows, HOP)


# ---------------------------------------------------------------------------
# Pallas kernel: STFT -> denoise (sub bias, clamp) -> iSTFT (overlap-add)
# ---------------------------------------------------------------------------
def _denoiser_kernel(strength_ref, frames_ref, wfwd_ref, wcos_ref, wsin_ref,
                     bias_ref, gain_ref, out_ref):
    # ---- forward STFT: one fused, lane-aligned bf16 matmul (M = B*F_pad) ---
    spec = jnp.dot(frames_ref[...], wfwd_ref[...],
                   preferred_element_type=jnp.float32)          # (M, 2*CPAD) f32
    real = spec[:, :CPAD]                                       # lane-aligned slices
    imag = spec[:, CPAD:]

    # ---- denoise in magnitude domain (rsqrt-based; no sqrt/div/where) ------
    s = real * real + imag * imag
    inv = jax.lax.rsqrt(jnp.maximum(s, TINY_F32))               # EUP slot
    mag = s * inv
    # factor = clamp(mag - bias*strength, 0) / mag ; phase preserved.
    # Where real == imag == 0 the spectrum is exactly 0, so factor's value
    # there is irrelevant (bias_spec >= 0 keeps this benign, as in PyTorch).
    factor = jnp.maximum(mag - bias_ref[...] * strength_ref[0], 0.0) * inv
    rec_r = (real * factor).astype(jnp.bfloat16)
    rec_i = (imag * factor).astype(jnp.bfloat16)

    # ---- inverse STFT: two half-K matmuls, result stays in registers -------
    y = (jnp.dot(rec_r, wcos_ref[...], preferred_element_type=jnp.float32) +
         jnp.dot(rec_i, wsin_ref[...], preferred_element_type=jnp.float32))  # (M, L)

    # ---- overlap-add (conv_transpose1d, stride = HOP) + window gain --------
    # Register-accumulated: zero-pad the HOP-wide pieces on VALUES (sublane
    # shift via concat), sum, and do a single aligned store per batch.
    g = gain_ref[...]
    batch = out_ref.shape[0]
    out_rows = out_ref.shape[1]
    n_frames = out_rows - (N_OVERLAP - 1)
    f_pad = y.shape[0] // batch                                 # sublane-aligned slab
    for b in range(batch):
        yb = y[b * f_pad:b * f_pad + n_frames, :]               # (n_frames, L)
        acc = None
        for k in range(N_OVERLAP):
            piece = yb[:, k * HOP:(k + 1) * HOP]                # (n_frames, HOP)
            parts = []
            if k:
                parts.append(jnp.zeros((k, HOP), jnp.float32))
            parts.append(piece)
            tail = N_OVERLAP - 1 - k
            if tail:
                parts.append(jnp.zeros((tail, HOP), jnp.float32))
            shifted = jnp.concatenate(parts, axis=0) if len(parts) > 1 else piece
            acc = shifted if acc is None else acc + shifted
        out_ref[b, :, :] = acc * g                              # ONE aligned store


# ---------------------------------------------------------------------------
# Wrapper (framing / reshapes are glue; all math above runs in the kernel)
# ---------------------------------------------------------------------------
def denoiser_forward(audio, bias_spec, strength=0.1):
    B, T = audio.shape
    L = FILTER_LENGTH
    assert T % HOP == 0, "keep T a multiple of hop for this synthetic example"
    n_frames = T // HOP + 1
    out_rows = n_frames + N_OVERLAP - 1
    f_pad = ((n_frames + 7) // 8) * 8            # sublane-aligned per-batch frames

    w_fwd_np, w_cos_np, w_sin_np = _fused_bases()
    w_fwd = jnp.asarray(w_fwd_np, jnp.bfloat16)                 # (L, 2*CPAD)
    w_cos = jnp.asarray(w_cos_np, jnp.bfloat16)                 # (CPAD, L)
    w_sin = jnp.asarray(w_sin_np, jnp.bfloat16)                 # (CPAD, L)
    gain = jnp.asarray(_gain(n_frames))                         # (out_rows, HOP) f32
    bias2d = jnp.asarray(bias_spec[:, :, 0], jnp.float32)       # (1, CUTOFF)
    bias_pad = jnp.pad(bias2d, ((0, 0), (0, CPAD - CUTOFF)))    # (1, CPAD), zero pad

    # reflect-pad + frame extraction (matches F.pad 'reflect' + conv1d stride)
    padded = jnp.pad(audio.astype(jnp.float32), ((0, 0), (L // 2, L // 2)),
                     mode="reflect")
    idx = np.arange(n_frames)[:, None] * HOP + np.arange(L)[None, :]
    frames = padded[:, idx]                                     # (B, F, L)
    frames = jnp.pad(frames, ((0, 0), (0, f_pad - n_frames), (0, 0)))
    frames = frames.reshape(B * f_pad, L).astype(jnp.bfloat16)  # (B*F_pad, L) bf16

    strength_arr = jnp.asarray([strength], dtype=jnp.float32)

    vmem = pltpu.MemorySpace.VMEM
    out = pl.pallas_call(
        _denoiser_kernel,
        out_shape=jax.ShapeDtypeStruct((B, out_rows, HOP), jnp.float32),
        in_specs=[
            pl.BlockSpec(memory_space=pltpu.MemorySpace.SMEM),  # strength (1,)
            pl.BlockSpec(memory_space=vmem),                    # frames (B*F_pad, L)
            pl.BlockSpec(memory_space=vmem),                    # W_fwd
            pl.BlockSpec(memory_space=vmem),                    # W_cos
            pl.BlockSpec(memory_space=vmem),                    # W_sin
            pl.BlockSpec(memory_space=vmem),                    # bias (1, CPAD)
            pl.BlockSpec(memory_space=vmem),                    # gain (out_rows, HOP)
        ],
        out_specs=pl.BlockSpec(memory_space=vmem),
        compiler_params=pltpu.CompilerParams(
            vmem_limit_bytes=32 * 1024 * 1024),                 # safe on v5e..v7x
    )(strength_arr, frames, w_fwd, w_cos, w_sin, bias_pad, gain)

    flat = out.reshape(B, 1, out_rows * HOP)
    return flat[:, :, L // 2: -(L // 2)]                        # (B, 1, T)


# ---------------------------------------------------------------------------
# Pure numpy reference of the same forward pass (loose sanity check)
# ---------------------------------------------------------------------------
def _reference_forward(audio, bias_spec, strength):
    fwd, invb = _stft_bases()
    fwd = fwd.astype(np.float64)
    invb = invb.astype(np.float64)
    audio = np.asarray(audio, np.float64)
    B, T = audio.shape
    L = FILTER_LENGTH
    n_frames = T // HOP + 1
    padded = np.pad(audio, ((0, 0), (L // 2, L // 2)), mode="reflect")
    idx = np.arange(n_frames)[:, None] * HOP + np.arange(L)[None, :]
    frames = padded[:, idx]                                          # (B, F, L)
    spec = frames @ fwd.T                                            # (B, F, 2C)
    real, imag = spec[..., :CUTOFF], spec[..., CUTOFF:]
    mag = np.sqrt(real ** 2 + imag ** 2)
    phase = np.arctan2(imag, real)
    den = np.maximum(mag - np.asarray(bias_spec, np.float64)[:, :, 0] * strength, 0.0)
    rec = np.concatenate([den * np.cos(phase), den * np.sin(phase)], axis=-1)
    y = rec @ invb                                                   # (B, F, L)
    n = L + HOP * (n_frames - 1)
    out = np.zeros((B, n))
    for t in range(n_frames):
        out[:, t * HOP:t * HOP + L] += y[:, t, :]
    wsum = _window_sumsquare(n_frames).astype(np.float64)
    nzi = wsum > np.finfo(np.float32).tiny
    out[:, nzi] /= wsum[nzi]
    out *= L / HOP
    return out[:, None, L // 2:-(L // 2)]


if __name__ == "__main__":
    B, T = 2, 1024
    key = jax.random.PRNGKey(0)
    k_audio, k_bias = jax.random.split(key)
    audio = jax.random.normal(k_audio, (B, T), dtype=jnp.float32)
    # TODO(synk): bias_spec would come from waveglow.infer(zeros) + STFT; here it is
    # synthesized deterministically with the same shape (1, cutoff, 1).
    bias_spec = jnp.abs(jax.random.normal(k_bias, (1, CUTOFF, 1), dtype=jnp.float32)) * 0.05

    out = denoiser_forward(audio, bias_spec, strength=0.1)
    out = jax.block_until_ready(out)

    assert out.shape == (B, 1, T), out.shape
    out_np = np.asarray(out)
    assert np.all(np.isfinite(out_np))

    ref = _reference_forward(audio, bias_spec, 0.1)
    rel_err = np.linalg.norm(out_np - ref) / (np.linalg.norm(ref) + 1e-12)
    assert rel_err < 0.1, f"relative error too large: {rel_err}"

    print("KERNEL_OK")
</pallas_src>

<mosaic_0001>
module attributes {stable_mosaic.version = 11 : i64} {
  func.func @_denoiser_kernel(%arg0: memref<1xf32, #tpu.memory_space<smem>>, %arg1: memref<32x512xbf16, #tpu.memory_space<vmem>>, %arg2: memref<512x768xbf16, #tpu.memory_space<vmem>>, %arg3: memref<384x512xbf16, #tpu.memory_space<vmem>>, %arg4: memref<384x512xbf16, #tpu.memory_space<vmem>>, %arg5: memref<1x384xf32, #tpu.memory_space<vmem>>, %arg6: memref<12x128xf32, #tpu.memory_space<vmem>>, %arg7: memref<2x12x128xf32, #tpu.memory_space<vmem>>) attributes {dimension_semantics = [], scalar_prefetch = 0 : i64, scratch_operands = 0 : i64, tpu.core_type = #tpu.core_type<tc>} {
    %c0 = arith.constant 0 : index
    %c0_0 = arith.constant 0 : index
    %0 = vector.load %arg1[%c0, %c0_0] : memref<32x512xbf16, #tpu.memory_space<vmem>>, vector<32x512xbf16>
    %c0_1 = arith.constant 0 : index
    %c0_2 = arith.constant 0 : index
    %1 = vector.load %arg2[%c0_1, %c0_2] : memref<512x768xbf16, #tpu.memory_space<vmem>>, vector<512x768xbf16>
    %cst = arith.constant dense<0.000000e+00> : vector<32x768xf32>
    %2 = tpu.matmul %0, %1, %cst {dimension_numbers = #tpu.dot_dimension_numbers<[1], [0], [0], [1], [0, 0, 1, 1], [], []>} : vector<32x512xbf16>, vector<512x768xbf16>, vector<32x768xf32> -> vector<32x768xf32>
    %3 = vector.extract_strided_slice %2 {offsets = [0, 0], sizes = [32, 384], strides = [1, 1]} : vector<32x768xf32> to vector<32x384xf32>
    %4 = vector.extract_strided_slice %2 {offsets = [0, 384], sizes = [32, 384], strides = [1, 1]} : vector<32x768xf32> to vector<32x384xf32>
    %5 = arith.mulf %3, %3 : vector<32x384xf32>
    %6 = arith.mulf %4, %4 : vector<32x384xf32>
    %7 = arith.addf %5, %6 : vector<32x384xf32>
    %cst_3 = arith.constant 1.17549435E-38 : f32
    %8 = vector.broadcast %cst_3 : f32 to vector<32x384xf32>
    %9 = arith.maximumf %7, %8 : vector<32x384xf32>
    %10 = math.rsqrt %9 : vector<32x384xf32>
    %11 = arith.mulf %7, %10 : vector<32x384xf32>
    %c0_4 = arith.constant 0 : index
    %c0_5 = arith.constant 0 : index
    %12 = vector.load %arg5[%c0_4, %c0_5] : memref<1x384xf32, #tpu.memory_space<vmem>>, vector<1x384xf32>
    %c0_6 = arith.constant 0 : index
    %13 = memref.load %arg0[%c0_6] : memref<1xf32, #tpu.memory_space<smem>>
    %14 = vector.broadcast %13 : f32 to vector<1x384xf32>
    %15 = arith.mulf %12, %14 : vector<1x384xf32>
    %16 = vector.broadcast %15 : vector<1x384xf32> to vector<32x384xf32>
    %17 = arith.subf %11, %16 : vector<32x384xf32>
    %cst_7 = arith.constant 0.000000e+00 : f32
    %18 = vector.broadcast %cst_7 : f32 to vector<32x384xf32>
    %19 = arith.maximumf %17, %18 : vector<32x384xf32>
    %20 = arith.mulf %19, %10 : vector<32x384xf32>
    %21 = arith.mulf %3, %20 : vector<32x384xf32>
    %22 = arith.truncf %21 : vector<32x384xf32> to vector<32x384xbf16>
    %23 = arith.mulf %4, %20 : vector<32x384xf32>
    %24 = arith.truncf %23 : vector<32x384xf32> to vector<32x384xbf16>
    %c0_8 = arith.constant 0 : index
    %c0_9 = arith.constant 0 : index
    %25 = vector.load %arg3[%c0_8, %c0_9] : memref<384x512xbf16, #tpu.memory_space<vmem>>, vector<384x512xbf16>
    %cst_10 = arith.constant dense<0.000000e+00> : vector<32x512xf32>
    %26 = tpu.matmul %22, %25, %cst_10 {dimension_numbers = #tpu.dot_dimension_numbers<[1], [0], [0], [1], [0, 0, 1, 1], [], []>} : vector<32x384xbf16>, vector<384x512xbf16>, vector<32x512xf32> -> vector<32x512xf32>
    %c0_11 = arith.constant 0 : index
    %c0_12 = arith.constant 0 : index
    %27 = vector.load %arg4[%c0_11, %c0_12] : memref<384x512xbf16, #tpu.memory_space<vmem>>, vector<384x512xbf16>
    %cst_13 = arith.constant dense<0.000000e+00> : vector<32x512xf32>
    %28 = tpu.matmul %24, %27, %cst_13 {dimension_numbers = #tpu.dot_dimension_numbers<[1], [0], [0], [1], [0, 0, 1, 1], [], []>} : vector<32x384xbf16>, vector<384x512xbf16>, vector<32x512xf32> -> vector<32x512xf32>
    %29 = arith.addf %26, %28 : vector<32x512xf32>
    %c0_14 = arith.constant 0 : index
    %c0_15 = arith.constant 0 : index
    %30 = vector.load %arg6[%c0_14, %c0_15] : memref<12x128xf32, #tpu.memory_space<vmem>>, vector<12x128xf32>
    %31 = vector.extract_strided_slice %29 {offsets = [0, 0], sizes = [9, 512], strides = [1, 1]} : vector<32x512xf32> to vector<9x512xf32>
    %32 = vector.extract_strided_slice %31 {offsets = [0, 0], sizes = [9, 128], strides = [1, 1]} : vector<9x512xf32> to vector<9x128xf32>
    %cst_16 = arith.constant 0.000000e+00 : f32
    %33 = vector.broadcast %cst_16 : f32 to vector<3x128xf32>
    %34 = tpu.concatenate %32, %33 in 0 : vector<9x128xf32>, vector<3x128xf32> -> vector<12x128xf32>
    %35 = vector.extract_strided_slice %31 {offsets = [0, 128], sizes = [9, 128], strides = [1, 1]} : vector<9x512xf32> to vector<9x128xf32>
    %cst_17 = arith.constant 0.000000e+00 : f32
    %36 = vector.broadcast %cst_17 : f32 to vector<1x128xf32>
    %cst_18 = arith.constant 0.000000e+00 : f32
    %37 = vector.broadcast %cst_18 : f32 to vector<2x128xf32>
    %38 = tpu.concatenate %36, %35, %37 in 0 : vector<1x128xf32>, vector<9x128xf32>, vector<2x128xf32> -> vector<12x128xf32>
    %39 = arith.addf %34, %38 : vector<12x128xf32>
    %40 = vector.extract_strided_slice %31 {offsets = [0, 256], sizes = [9, 128], strides = [1, 1]} : vector<9x512xf32> to vector<9x128xf32>
    %cst_19 = arith.constant 0.000000e+00 : f32
    %41 = vector.broadcast %cst_19 : f32 to vector<2x128xf32>
    %cst_20 = arith.constant 0.000000e+00 : f32
    %42 = vector.broadcast %cst_20 : f32 to vector<1x128xf32>
    %43 = tpu.concatenate %41, %40, %42 in 0 : vector<2x128xf32>, vector<9x128xf32>, vector<1x128xf32> -> vector<12x128xf32>
    %44 = arith.addf %39, %43 : vector<12x128xf32>
    %45 = vector.extract_strided_slice %31 {offsets = [0, 384], sizes = [9, 128], strides = [1, 1]} : vector<9x512xf32> to vector<9x128xf32>
    %cst_21 = arith.constant 0.000000e+00 : f32
    %46 = vector.broadcast %cst_21 : f32 to vector<3x128xf32>
    %47 = tpu.concatenate %46, %45 in 0 : vector<3x128xf32>, vector<9x128xf32> -> vector<12x128xf32>
    %48 = arith.addf %44, %47 : vector<12x128xf32>
    %49 = arith.mulf %48, %30 : vector<12x128xf32>
    %c0_22 = arith.constant 0 : index
    %c0_23 = arith.constant 0 : index
    %c0_24 = arith.constant 0 : index
    %50 = vector.load %arg7[%c0_22, %c0_23, %c0_24] : memref<2x12x128xf32, #tpu.memory_space<vmem>>, vector<1x12x128xf32>
    %51 = vector.shape_cast %50 : vector<1x12x128xf32> to vector<12x128xf32>
    %52 = vector.shape_cast %49 : vector<12x128xf32> to vector<1x12x128xf32>
    tpu.vector_store %arg7[%c0_22, %c0_23, %c0_24], %52 {strides = array<i32>} : memref<2x12x128xf32, #tpu.memory_space<vmem>>, vector<1x12x128xf32>,
    %53 = vector.extract_strided_slice %29 {offsets = [16, 0], sizes = [9, 512], strides = [1, 1]} : vector<32x512xf32> to vector<9x512xf32>
    %54 = vector.extract_strided_slice %53 {offsets = [0, 0], sizes = [9, 128], strides = [1, 1]} : vector<9x512xf32> to vector<9x128xf32>
    %cst_25 = arith.constant 0.000000e+00 : f32
    %55 = vector.broadcast %cst_25 : f32 to vector<3x128xf32>
    %56 = tpu.concatenate %54, %55 in 0 : vector<9x128xf32>, vector<3x128xf32> -> vector<12x128xf32>
    %57 = vector.extract_strided_slice %53 {offsets = [0, 128], sizes = [9, 128], strides = [1, 1]} : vector<9x512xf32> to vector<9x128xf32>
    %cst_26 = arith.constant 0.000000e+00 : f32
    %58 = vector.broadcast %cst_26 : f32 to vector<1x128xf32>
    %cst_27 = arith.constant 0.000000e+00 : f32
    %59 = vector.broadcast %cst_27 : f32 to vector<2x128xf32>
    %60 = tpu.concatenate %58, %57, %59 in 0 : vector<1x128xf32>, vector<9x128xf32>, vector<2x128xf32> -> vector<12x128xf32>
    %61 = arith.addf %56, %60 : vector<12x128xf32>
    %62 = vector.extract_strided_slice %53 {offsets = [0, 256], sizes = [9, 128], strides = [1, 1]} : vector<9x512xf32> to vector<9x128xf32>
    %cst_28 = arith.constant 0.000000e+00 : f32
    %63 = vector.broadcast %cst_28 : f32 to vector<2x128xf32>
    %cst_29 = arith.constant 0.000000e+00 : f32
    %64 = vector.broadcast %cst_29 : f32 to vector<1x128xf32>
    %65 = tpu.concatenate %63, %62, %64 in 0 : vector<2x128xf32>, vector<9x128xf32>, vector<1x128xf32> -> vector<12x128xf32>
    %66 = arith.addf %61, %65 : vector<12x128xf32>
    %67 = vector.extract_strided_slice %53 {offsets = [0, 384], sizes = [9, 128], strides = [1, 1]} : vector<9x512xf32> to vector<9x128xf32>
    %cst_30 = arith.constant 0.000000e+00 : f32
    %68 = vector.broadcast %cst_30 : f32 to vector<3x128xf32>
    %69 = tpu.concatenate %68, %67 in 0 : vector<3x128xf32>, vector<9x128xf32> -> vector<12x128xf32>
    %70 = arith.addf %66, %69 : vector<12x128xf32>
    %71 = arith.mulf %70, %30 : vector<12x128xf32>
    %c1 = arith.constant 1 : index
    %c0_31 = arith.constant 0 : index
    %c0_32 = arith.constant 0 : index
    %72 = vector.load %arg7[%c1, %c0_31, %c0_32] : memref<2x12x128xf32, #tpu.memory_space<vmem>>, vector<1x12x128xf32>
    %73 = vector.shape_cast %72 : vector<1x12x128xf32> to vector<12x128xf32>
    %74 = vector.shape_cast %71 : vector<12x128xf32> to vector<1x12x128xf32>
    tpu.vector_store %arg7[%c1, %c0_31, %c0_32], %74 {strides = array<i32>} : memref<2x12x128xf32, #tpu.memory_space<vmem>>, vector<1x12x128xf32>,
    return
  }
}

</mosaic_0001>

<bundles_post_ra>
// kernel: tpu_custom_call.1
= control target key start
LH: loop header
LB: loop body
LE: loop exit
PB: predicated region body
PF: predicated region fallthrough
CT: control target
= control target key end

     0   :  { %13 = vsyncpa [#allocation4], 0  ;;  %s4985_s0 = inlined_call_operand.<no memory space> [shape: f32[1], index: 0, kind: input, shape index: {}]   ;;  %s4986_s1 = inlined_call_operand.hbm [shape: bf16[32,512], index: 1, kind: input, shape index: {}]   ;;  %s4987_s2 = inlined_call_operand.hbm [shape: bf16[512,768], index: 2, kind: input, shape index: {}]   ;;  %s4988_s3 = inlined_call_operand.hbm [shape: bf16[384,512], index: 3, kind: input, shape index: {}]   ;;  %s4989_s4 = inlined_call_operand.hbm [shape: bf16[384,512], index: 4, kind: input, shape index: {}]   ;;  %s4990_s5 = inlined_call_operand.vmem [shape: f32[1,384], index: 5, kind: input, shape index: {}]   ;;  %s4991_s6 = inlined_call_operand.vmem [shape: f32[12,128], index: 6, kind: input, shape index: {}]   ;;  %s4992_s7 = inlined_call_operand.vmem [shape: f32[2,12,128], index: 7, kind: output, shape index: {}]  }
   0x1   :  { %14 = vsyncpa [#allocation6], 0 }
   0x2   :  { %15 = vsyncpa [#allocation9], 0  ;;  %s4614_s24 = smov [#allocation5]   ;;  %s4520_s28 = scalar_lea.hbm %s4987_s2, 24576 }
   0x3   :  { %s35_s25 = sshll.u32 %s4614_s24, 4  ;;  %p4521_p0 = scmp.ne.s32.totalorder %s4987_s2, %s4520_s28  ;;  %s36_s25 = int_to_ptr.vmem [resolvable:$true] %s35_s25 }
   0x4   :  { %p4524_p1 = scmp.lt.u32.totalorder %s4520_s28, %s4987_s2 }
   0x6   :  { %p4526_p2 = pnand %p4524_p1, %p4521_p0 }
   0x8   :  { %4529 = shalt.err (!%p4526_p2)
}
   0x9   :  { %s4530_s10 = scalar_lea.vmem %s36_s25, 24576  ;;  %p4535_p4 = scmp.lt.s32.totalorder %s36_s25, %s36_s25 }
   0xa   :  { %p4531_p3 = scmp.ne.s32.totalorder %s36_s25, %s4530_s10  ;;  %p4536_p5 = scmp.lt.s32.totalorder %s4530_s10, %s4530_s10 }
   0xc   :  { %p4537_p6 = por %p4536_p5, %p4535_p4 }
   0xe   :  { %p4538_p7 = pnand %p4537_p6, %p4531_p3 }
  0x10   :  { %4541 = shalt.err (!%p4538_p7)
}
  0x11   :  { %s4615_s11 = smov 384   ;;  %s4616_s12 = smov 24  }
  0x12   :  { %41 = dma.hbm_to_vmem [thread:$0]  %s4987_s2, 24576, %s36_s25, [#allocation6], %s4615_s11, %s4615_s11, %s4616_s12  }
  0x13   :  { %s4617_s15 = smov [#allocation3]   ;;  %s4542_s19 = scalar_lea.hbm %s4986_s1, 1024 }
  0x14   :  { %s23_s16 = sshll.u32 %s4617_s15, 4  ;;  %p4543_p8 = scmp.ne.s32.totalorder %s4986_s1, %s4542_s19  ;;  %s24_s16 = int_to_ptr.vmem [resolvable:$true] %s23_s16 }
  0x15   :  { %p4546_p9 = scmp.lt.u32.totalorder %s4542_s19, %s4986_s1 }
  0x17   :  { %p4548_p10 = pnand %p4546_p9, %p4543_p8 }
  0x19   :  { %4551 = shalt.err (!%p4548_p10)
}
  0x1a   :  { %s4552_s24 = scalar_lea.vmem %s24_s16, 1024  ;;  %p4557_p12 = scmp.lt.s32.totalorder %s24_s16, %s24_s16 }
  0x1b   :  { %p4553_p11 = scmp.ne.s32.totalorder %s24_s16, %s4552_s24  ;;  %p4558_p13 = scmp.lt.s32.totalorder %s4552_s24, %s4552_s24 }
  0x1d   :  { %p4559_p0 = por %p4558_p13, %p4557_p12 }
  0x1f   :  { %p4560_p1 = pnand %p4559_p0, %p4553_p11 }
  0x21   :  { %4563 = shalt.err (!%p4560_p1)
}
  0x22   :  { %s4618_s2 = smov 256   ;;  %s4619_s25 = smov 16  }
  0x23   :  { %29 = dma.hbm_to_vmem [thread:$0]  %s4986_s1, 1024, %s24_s16, [#allocation4], %s4618_s2, %s4618_s2, %s4619_s25  }
  0x24   :  { %s4620_s28 = smov [#allocation7]   ;;  %s4621_s30 = smov [#allocation8]  }
  0x25   :  { %s47_s29 = sshll.u32 %s4620_s28, 4  ;;  %s59_s8 = sshll.u32 %s4621_s30, 4  ;;  %s48_s29 = int_to_ptr.vmem [resolvable:$true] %s47_s29  ;;  %s4690_s8 = int_to_ptr.vmem [resolvable:$true] %s59_s8 }
  0x26   :  { %s4564_s11 = scalar_lea.hbm %s4988_s3, 12288 }
  0x27   :  { %p4565_p2 = scmp.ne.s32.totalorder %s4988_s3, %s4564_s11  ;;  %p4568_p3 = scmp.lt.u32.totalorder %s4564_s11, %s4988_s3 }
  0x29   :  { %p4570_p4 = pnand %p4568_p3, %p4565_p2 }
  0x2b   :  { %4573 = shalt.err (!%p4570_p4)
}
  0x2c   :  { %s4574_s1 = scalar_lea.vmem %s48_s29, 12288  ;;  %p4579_p6 = scmp.lt.s32.totalorder %s48_s29, %s48_s29 }
  0x2d   :  { %p4575_p5 = scmp.ne.s32.totalorder %s48_s29, %s4574_s1  ;;  %p4580_p7 = scmp.lt.s32.totalorder %s4574_s1, %s4574_s1 }
  0x2f   :  { %p4581_p8 = por %p4580_p7, %p4579_p6 }
  0x31   :  { %p4582_p9 = pnand %p4581_p8, %p4575_p5 }
  0x33   :  { %4585 = shalt.err (!%p4582_p9)
}
  0x34   :  { %53 = dma.hbm_to_vmem [thread:$0]  %s4988_s3, 12288, %s48_s29, [#allocation6], %s4618_s2, %s4618_s2, %s4619_s25  }
  0x35   :  { %s4586_s20 = scalar_lea.hbm %s4989_s4, 12288 }
  0x36   :  { %p4587_p10 = scmp.ne.s32.totalorder %s4989_s4, %s4586_s20  ;;  %p4590_p11 = scmp.lt.u32.totalorder %s4586_s20, %s4989_s4 }
  0x38   :  { %p4592_p12 = pnand %p4590_p11, %p4587_p10 }
  0x3a   :  { %4595 = shalt.err (!%p4592_p12)
}
  0x3b   :  { %s4596_s26 = scalar_lea.vmem %s4690_s8, 12288  ;;  %p4601_p0 = scmp.lt.s32.totalorder %s4690_s8, %s4690_s8 }
  0x3c   :  { %p4597_p13 = scmp.ne.s32.totalorder %s4690_s8, %s4596_s26  ;;  %p4602_p1 = scmp.lt.s32.totalorder %s4596_s26, %s4596_s26 }
  0x3e   :  { %p4603_p2 = por %p4602_p1, %p4601_p0 }
  0x40   :  { %p4604_p3 = pnand %p4603_p2, %p4597_p13 }
  0x42   :  { %4607 = shalt.err (!%p4604_p3)
}
  0x43   :  { %65 = dma.hbm_to_vmem [thread:$0]  %s4989_s4, 12288, %s4690_s8, [#allocation9], %s4618_s2, %s4618_s2, %s4619_s25  }
  0x44   :  { %4608 = dma.done.wait [#allocation4], 1024  }
  0x45   :  { %4609 = vsyncadd [#allocation4], 4294966272 }
  0x46   :  { %4610 = dma.done.wait [#allocation6], 36864  }
  0x47   :  { %4611 = vsyncadd [#allocation6], 4294930432 }
  0x48   :  { %4612 = dma.done.wait [#allocation9], 12288  }
  0x49   :  { %4613 = vsyncadd [#allocation9], 4294955008  ;;  %v3903_v0 = vld [vmem:[#allocation5 + $0x4] ss:$24 sps:$4 sm:$0xff]   ;;  %v3905_v1 = vld [vmem:[#allocation5] ss:$24 sps:$4 sm:$0xff]  }
  0x4a   :  { %1283 = vmatprep.subr.bf16.mxu0 %v3903_v0  ;;  %v3906_v2 = vld [vmem:[#allocation5 + $0x34] ss:$24 sps:$4 sm:$0xff]   ;;  %v3908_v3 = vld [vmem:[#allocation5 + $0x30] ss:$24 sps:$4 sm:$0xff]   ;;  %v3909_v4 = vld [vmem:[#allocation5 + $0x64] ss:$24 sps:$4 sm:$0xff]  }
  0x4b   :  { %1284 = vmatpush1.bf16.msra.mxu0 %v3905_v1  ;;  %v3911_v5 = vld [vmem:[#allocation5 + $0x60] ss:$24 sps:$4 sm:$0xff]   ;;  %v3912_v6 = vld [vmem:[#allocation5 + $0x94] ss:$24 sps:$4 sm:$0xff]   ;;  %v3914_v7 = vld [vmem:[#allocation5 + $0x90] ss:$24 sps:$4 sm:$0xff]  }
  0x4c   :  { %1285 = vmatprep.subr.bf16.mxu0 %v3906_v2  ;;  %v3915_v8 = vld [vmem:[#allocation5 + $0xc4] ss:$24 sps:$4 sm:$0xff]   ;;  %v3917_v9 = vld [vmem:[#allocation5 + $0xc0] ss:$24 sps:$4 sm:$0xff]   ;;  %v3918_v10 = vld [vmem:[#allocation5 + $0xf4] ss:$24 sps:$4 sm:$0xff]  }
  0x4d   :  { %v3920_v11 = vld [vmem:[#allocation5 + $0xf0] ss:$24 sps:$4 sm:$0xff]   ;;  %v3921_v12 = vld [vmem:[#allocation5 + $0x124] ss:$24 sps:$4 sm:$0xff]   ;;  %v3923_v14 = vld [vmem:[#allocation5 + $0x120] ss:$24 sps:$4 sm:$0xff]  }
  0x4e   :  { %v4727_v13 = vld [vmem:[#allocation3 + $0x4] ss:$16 sps:$4 sm:$0xff]   ;;  %v3926_v16 = vld [vmem:[#allocation5 + $0x150] ss:$24 sps:$4 sm:$0xff]   ;;  %v3929_v18 = vld [vmem:[#allocation5 + $0x180] ss:$24 sps:$4 sm:$0xff]  }
  0x4f   :  { %1286 = vmatpush1.bf16.msra.mxu0 %v3908_v3  ;;  %v3924_v15 = vld [vmem:[#allocation5 + $0x154] ss:$24 sps:$4 sm:$0xff]   ;;  %1315 = vmatprep.mubr.bf16.mxu0 %v4727_v13  ;;  %v3927_v17 = vld [vmem:[#allocation5 + $0x184] ss:$24 sps:$4 sm:$0xff]   ;;  %v3932_v20 = vld [vmem:[#allocation5 + $0x1b0] ss:$24 sps:$4 sm:$0xff]  }
  0x50   :  { %1287 = vmatprep.subr.bf16.mxu0 %v3909_v4  ;;  %v3930_v19 = vld [vmem:[#allocation5 + $0x1b4] ss:$24 sps:$4 sm:$0xff]   ;;  %v3933_v21 = vld [vmem:[#allocation5 + $0x1e4] ss:$24 sps:$4 sm:$0xff]   ;;  %v3935_v22 = vld [vmem:[#allocation5 + $0x1e0] ss:$24 sps:$4 sm:$0xff]  }
  0x51   :  { %v3936_v23 = vld [vmem:[#allocation5 + $0x214] ss:$24 sps:$4 sm:$0xff]   ;;  %v3938_v24 = vld [vmem:[#allocation5 + $0x210] ss:$24 sps:$4 sm:$0xff]   ;;  %v3939_v25 = vld [vmem:[#allocation5 + $0x244] ss:$24 sps:$4 sm:$0xff]  }
  0x52   :  { %v3941_v26 = vld [vmem:[#allocation5 + $0x240] ss:$24 sps:$4 sm:$0xff]   ;;  %v3942_v27 = vld [vmem:[#allocation5 + $0x274] ss:$24 sps:$4 sm:$0xff]   ;;  %v3944_v28 = vld [vmem:[#allocation5 + $0x270] ss:$24 sps:$4 sm:$0xff]  }
  0x53   :  { %1288 = vmatpush1.bf16.msra.mxu0 %v3911_v5  ;;  %v3945_v29 = vld [vmem:[#allocation5 + $0x2a4] ss:$24 sps:$4 sm:$0xff]   ;;  %v3947_v30 = vld [vmem:[#allocation5 + $0x2a0] ss:$24 sps:$4 sm:$0xff]   ;;  %v3948_v31 = vld [vmem:[#allocation5 + $0x2d4] ss:$24 sps:$4 sm:$0xff]  }
  0x54   :  { %1289 = vmatprep.subr.bf16.mxu0 %v3912_v6  ;;  %v3950_v32 = vld [vmem:[#allocation5 + $0x2d0] ss:$24 sps:$4 sm:$0xff]   ;;  %v3955_v33 = vld [vmem:[#allocation5 + $0x304] ss:$24 sps:$4 sm:$0xff]   ;;  %v3953_v35 = vld [vmem:[#allocation5 + $0x300] ss:$24 sps:$4 sm:$0xff]  }
  0x55   :  { %v4730_v34 = vld [vmem:[#allocation3] ss:$16 sps:$4 sm:$0xff]   ;;  %v4732_v36 = vld [vmem:[#allocation3 + $0x24] ss:$16 sps:$4 sm:$0xff]   ;;  %v4738_v42 = vld [vmem:[#allocation3 + $0xc] ss:$16 sps:$4 sm:$0xff]  }
  0x56   :  { %v3959_v37 = vld [vmem:[#allocation5 + $0x334] ss:$24 sps:$4 sm:$0xff]   ;;  %v3957_v38 = vld [vmem:[#allocation5 + $0x330] ss:$24 sps:$4 sm:$0xff]   ;;  %v3962_v39 = vld [vmem:[#allocation5 + $0x364] ss:$24 sps:$4 sm:$0xff]  }
  0x57   :  { %1290 = vmatpush1.bf16.msra.mxu0 %v3914_v7  ;;  %v4736_v40 = vld [vmem:[#allocation3 + $0x20] ss:$16 sps:$4 sm:$0xff]   ;;  %v3965_v43 = vld [vmem:[#allocation5 + $0x394] ss:$24 sps:$4 sm:$0xff]   ;;  %v3968_v45 = vld [vmem:[#allocation5 + $0x3c4] ss:$24 sps:$4 sm:$0xff]  }
  0x58   :  { %1291 = vmatprep.subr.bf16.mxu0 %v3915_v8  ;;  %v3960_v41 = vld [vmem:[#allocation5 + $0x360] ss:$24 sps:$4 sm:$0xff]   ;;  %v3963_v44 = vld [vmem:[#allocation5 + $0x390] ss:$24 sps:$4 sm:$0xff]   ;;  %v3971_v47 = vld [vmem:[#allocation5 + $0x3f4] ss:$24 sps:$4 sm:$0xff]  }
  0x59   :  { %v3966_v46 = vld [vmem:[#allocation5 + $0x3c0] ss:$24 sps:$4 sm:$0xff]   ;;  %v3969_v48 = vld [vmem:[#allocation5 + $0x3f0] ss:$24 sps:$4 sm:$0xff]   ;;  %v3974_v49 = vld [vmem:[#allocation5 + $0x424] ss:$24 sps:$4 sm:$0xff]  }
  0x5a   :  { %v3972_v50 = vld [vmem:[#allocation5 + $0x420] ss:$24 sps:$4 sm:$0xff]   ;;  %v3977_v51 = vld [vmem:[#allocation5 + $0x454] ss:$24 sps:$4 sm:$0xff]   ;;  %v3975_v52 = vld [vmem:[#allocation5 + $0x450] ss:$24 sps:$4 sm:$0xff]  }
  0x5b   :  { %1292 = vmatpush1.bf16.msra.mxu0 %v3917_v9  ;;  %v3980_v53 = vld [vmem:[#allocation5 + $0x484] ss:$24 sps:$4 sm:$0xff]   ;;  %v3978_v54 = vld [vmem:[#allocation5 + $0x480] ss:$24 sps:$4 sm:$0xff]   ;;  %v3983_v55 = vld [vmem:[#allocation5 + $0x4b4] ss:$24 sps:$4 sm:$0xff]  }
  0x5c   :  { %1293 = vmatprep.subr.bf16.mxu0 %v3918_v10  ;;  %v3981_v56 = vld [vmem:[#allocation5 + $0x4b0] ss:$24 sps:$4 sm:$0xff]   ;;  %v3986_v57 = vld [vmem:[#allocation5 + $0x4e4] ss:$24 sps:$4 sm:$0xff]   ;;  %v3984_v58 = vld [vmem:[#allocation5 + $0x4e0] ss:$24 sps:$4 sm:$0xff]  }
  0x5d   :  { %v3989_v59 = vld [vmem:[#allocation5 + $0x514] ss:$24 sps:$4 sm:$0xff]   ;;  %v3987_v60 = vld [vmem:[#allocation5 + $0x510] ss:$24 sps:$4 sm:$0xff]   ;;  %v3992_v61 = vld [vmem:[#allocation5 + $0x544] ss:$24 sps:$4 sm:$0xff]  }
  0x5e   :  { %v3990_v62 = vld [vmem:[#allocation5 + $0x540] ss:$24 sps:$4 sm:$0xff]   ;;  %v3995_v63 = vld [vmem:[#allocation5 + $0x574] ss:$24 sps:$4 sm:$0xff]   ;;  %v3993_v0 = vld [vmem:[#allocation5 + $0x570] ss:$24 sps:$4 sm:$0xff]  }
  0x5f   :  { %1294 = vmatpush1.bf16.msra.mxu0 %v3920_v11  ;;  %v4001_v1 = vld [vmem:[#allocation5 + $0x5a4] ss:$24 sps:$4 sm:$0xff]   ;;  %v3999_v2 = vld [vmem:[#allocation5 + $0x5a0] ss:$24 sps:$4 sm:$0xff]   ;;  %v4004_v3 = vld [vmem:[#allocation5 + $0x5d4] ss:$24 sps:$4 sm:$0xff]  }
  0x60   :  { %1295 = vmatprep.subr.bf16.mxu0 %v3921_v12  ;;  %v4002_v4 = vld [vmem:[#allocation5 + $0x5d0] ss:$24 sps:$4 sm:$0xff]   ;;  %v4010_v5 = vld [vmem:[#allocation5 + $0xc] ss:$24 sps:$4 sm:$0xff]   ;;  %v4013_v9 = vld [vmem:[#allocation5 + $0x3c] ss:$24 sps:$4 sm:$0xff]  }
  0x61   :  { %v4742_v6 = vld [vmem:[#allocation3 + $0x8] ss:$16 sps:$4 sm:$0xff]   ;;  %v4744_v8 = vld [vmem:[#allocation3 + $0x2c] ss:$16 sps:$4 sm:$0xff]   ;;  %vm3343_vm0 = vcmask 1040384   ;;  %vm3353_vm1 = vcmask 1041408  }
  0x62   :  { %v4008_v7 = vld [vmem:[#allocation5 + $0x8] ss:$24 sps:$4 sm:$0xff]   ;;  %v4011_v10 = vld [vmem:[#allocation5 + $0x38] ss:$24 sps:$4 sm:$0xff]   ;;  %v4019_v11 = vld [vmem:[#allocation5 + $0x6c] ss:$24 sps:$4 sm:$0xff]  }
  0x63   :  { %1296 = vmatpush1.bf16.msra.mxu0 %v3923_v14  ;;  %v4748_v12 = vld [vmem:[#allocation3 + $0x28] ss:$16 sps:$4 sm:$0xff]   ;;  %vm3365_vm2 = vcmask 1042432  }
  0x64   :  { %1297 = vmatprep.subr.bf16.mxu0 %v3924_v15  ;;  %v4017_v14 = vld [vmem:[#allocation5 + $0x68] ss:$24 sps:$4 sm:$0xff]   ;;  %v4022_v15 = vld [vmem:[#allocation5 + $0x9c] ss:$24 sps:$4 sm:$0xff]  }
  0x67   :  { %1298 = vmatpush1.bf16.msra.mxu0 %v3926_v16  ;;  %v4020_v16 = vld [vmem:[#allocation5 + $0x98] ss:$24 sps:$4 sm:$0xff]  }
  0x68   :  { %1299 = vmatprep.subr.bf16.mxu0 %v3927_v17  ;;  %v4025_v17 = vld [vmem:[#allocation5 + $0xcc] ss:$24 sps:$4 sm:$0xff]  }
  0x6b   :  { %1300 = vmatpush1.bf16.msra.mxu0 %v3929_v18  ;;  %v4023_v18 = vld [vmem:[#allocation5 + $0xc8] ss:$24 sps:$4 sm:$0xff]  }
  0x6c   :  { %1301 = vmatprep.subr.bf16.mxu0 %v3930_v19  ;;  %v4028_v19 = vld [vmem:[#allocation5 + $0xfc] ss:$24 sps:$4 sm:$0xff]  }
  0x6f   :  { %1302 = vmatpush1.bf16.msra.mxu0 %v3932_v20  ;;  %v4026_v20 = vld [vmem:[#allocation5 + $0xf8] ss:$24 sps:$4 sm:$0xff]  }
  0x70   :  { %1303 = vmatprep.subr.bf16.mxu0 %v3933_v21  ;;  %v4031_v21 = vld [vmem:[#allocation5 + $0x12c] ss:$24 sps:$4 sm:$0xff]  }
  0x73   :  { %1304 = vmatpush1.bf16.msra.mxu0 %v3935_v22  ;;  %v4029_v22 = vld [vmem:[#allocation5 + $0x128] ss:$24 sps:$4 sm:$0xff]  }
  0x74   :  { %1305 = vmatprep.subr.bf16.mxu0 %v3936_v23  ;;  %v4034_v23 = vld [vmem:[#allocation5 + $0x15c] ss:$24 sps:$4 sm:$0xff]  }
  0x77   :  { %1306 = vmatpush1.bf16.msra.mxu0 %v3938_v24  ;;  %v4032_v24 = vld [vmem:[#allocation5 + $0x158] ss:$24 sps:$4 sm:$0xff]  }
  0x78   :  { %1307 = vmatprep.subr.bf16.mxu0 %v3939_v25  ;;  %v4037_v25 = vld [vmem:[#allocation5 + $0x18c] ss:$24 sps:$4 sm:$0xff]  }
  0x7b   :  { %1308 = vmatpush1.bf16.msra.mxu0 %v3941_v26  ;;  %v4035_v26 = vld [vmem:[#allocation5 + $0x188] ss:$24 sps:$4 sm:$0xff]  }
  0x7c   :  { %1309 = vmatprep.subr.bf16.mxu0 %v3942_v27  ;;  %v4038_v27 = vld [vmem:[#allocation5 + $0x1b8] ss:$24 sps:$4 sm:$0xff]  }
  0x7f   :  { %1310 = vmatpush1.bf16.msra.mxu0 %v3944_v28  ;;  %v4043_v28 = vld [vmem:[#allocation5 + $0x1ec] ss:$24 sps:$4 sm:$0xff]  }
  0x80   :  { %1311 = vmatprep.subr.bf16.mxu0 %v3945_v29  ;;  %v4041_v29 = vld [vmem:[#allocation5 + $0x1e8] ss:$24 sps:$4 sm:$0xff]  }
  0x83   :  { %1312 = vmatpush1.bf16.msra.mxu0 %v3947_v30  ;;  %v4046_v30 = vld [vmem:[#allocation5 + $0x21c] ss:$24 sps:$4 sm:$0xff]  }
  0x84   :  { %1313 = vmatprep.subr.bf16.mxu0 %v3948_v31  ;;  %v4044_v31 = vld [vmem:[#allocation5 + $0x218] ss:$24 sps:$4 sm:$0xff]  }
  0x87   :  { %1314 = vmatpush1.bf16.msra.mxu0 %v3950_v32  ;;  %v4049_v32 = vld [vmem:[#allocation5 + $0x24c] ss:$24 sps:$4 sm:$0xff]  }
  0x88   :  { %1336 = vmatprep.subr.bf16.mxu0 %v3955_v33  ;;  %v4047_v33 = vld [vmem:[#allocation5 + $0x248] ss:$24 sps:$4 sm:$0xff]  }
  0x8a   :  { %1316 = vmatmul.mubr.bf16.vlgmr.msra.gmra.mrb[0].mxu0 %v4730_v34 }
  0x8b   :  { %1337 = vmatpush1.bf16.msra.mxu0 %v3953_v35  ;;  %1325 = vmatprep.mubr.bf16.mxu0 %v4732_v36  ;;  %v4052_v35 = vld [vmem:[#allocation5 + $0x27c] ss:$24 sps:$4 sm:$0xff]  }
  0x8c   :  { %1338 = vmatprep.subr.bf16.mxu0 %v3959_v37  ;;  %v4050_v37 = vld [vmem:[#allocation5 + $0x278] ss:$24 sps:$4 sm:$0xff]  }
  0x8f   :  { %1339 = vmatpush1.bf16.msra.mxu0 %v3957_v38  ;;  %v4055_v38 = vld [vmem:[#allocation5 + $0x2ac] ss:$24 sps:$4 sm:$0xff]  }
  0x90   :  { %1340 = vmatprep.subr.bf16.mxu0 %v3962_v39  ;;  %v4053_v39 = vld [vmem:[#allocation5 + $0x2a8] ss:$24 sps:$4 sm:$0xff]  }
  0x92   :  { %1326 = vmatmul.mubr.bf16.gmra.mrb[4].mxu0 %v4736_v40 }
  0x93   :  { %1341 = vmatpush1.bf16.msra.mxu0 %v3960_v41  ;;  %1368 = vmatprep.mubr.bf16.mxu0 %v4738_v42  ;;  %v4058_v41 = vld [vmem:[#allocation5 + $0x2dc] ss:$24 sps:$4 sm:$0xff]  }
  0x94   :  { %1342 = vmatprep.subr.bf16.mxu0 %v3965_v43  ;;  %v4056_v43 = vld [vmem:[#allocation5 + $0x2d8] ss:$24 sps:$4 sm:$0xff]  }
  0x97   :  { %1343 = vmatpush1.bf16.msra.mxu0 %v3963_v44  ;;  %v4061_v44 = vld [vmem:[#allocation5 + $0x30c] ss:$24 sps:$4 sm:$0xff]  }
  0x98   :  { %1344 = vmatprep.subr.bf16.mxu0 %v3968_v45  ;;  %v4059_v45 = vld [vmem:[#allocation5 + $0x308] ss:$24 sps:$4 sm:$0xff]  }
  0x9b   :  { %1345 = vmatpush1.bf16.msra.mxu0 %v3966_v46  ;;  %v4064_v46 = vld [vmem:[#allocation5 + $0x33c] ss:$24 sps:$4 sm:$0xff]  }
  0x9c   :  { %1346 = vmatprep.subr.bf16.mxu0 %v3971_v47  ;;  %v4062_v47 = vld [vmem:[#allocation5 + $0x338] ss:$24 sps:$4 sm:$0xff]  }
  0x9f   :  { %1347 = vmatpush1.bf16.msra.mxu0 %v3969_v48  ;;  %v4067_v48 = vld [vmem:[#allocation5 + $0x36c] ss:$24 sps:$4 sm:$0xff]  }
  0xa0   :  { %1348 = vmatprep.subr.bf16.mxu0 %v3974_v49  ;;  %v4065_v49 = vld [vmem:[#allocation5 + $0x368] ss:$24 sps:$4 sm:$0xff]  }
  0xa3   :  { %1349 = vmatpush1.bf16.msra.mxu0 %v3972_v50  ;;  %v4070_v50 = vld [vmem:[#allocation5 + $0x39c] ss:$24 sps:$4 sm:$0xff]  }
  0xa4   :  { %1350 = vmatprep.subr.bf16.mxu0 %v3977_v51  ;;  %v4068_v51 = vld [vmem:[#allocation5 + $0x398] ss:$24 sps:$4 sm:$0xff]  }
  0xa7   :  { %1351 = vmatpush1.bf16.msra.mxu0 %v3975_v52  ;;  %v4073_v52 = vld [vmem:[#allocation5 + $0x3cc] ss:$24 sps:$4 sm:$0xff]  }
  0xa8   :  { %1352 = vmatprep.subr.bf16.mxu0 %v3980_v53  ;;  %v4076_v53 = vld [vmem:[#allocation5 + $0x3fc] ss:$24 sps:$4 sm:$0xff]  }
  0xab   :  { %1353 = vmatpush1.bf16.msra.mxu0 %v3978_v54  ;;  %v4079_v54 = vld [vmem:[#allocation5 + $0x42c] ss:$24 sps:$4 sm:$0xff]  }
  0xac   :  { %1354 = vmatprep.subr.bf16.mxu0 %v3983_v55  ;;  %v4077_v55 = vld [vmem:[#allocation5 + $0x428] ss:$24 sps:$4 sm:$0xff]  }
  0xaf   :  { %1355 = vmatpush1.bf16.msra.mxu0 %v3981_v56  ;;  %v4082_v56 = vld [vmem:[#allocation5 + $0x45c] ss:$24 sps:$4 sm:$0xff]  }
  0xb0   :  { %1356 = vmatprep.subr.bf16.mxu0 %v3986_v57  ;;  %v4085_v57 = vld [vmem:[#allocation5 + $0x48c] ss:$24 sps:$4 sm:$0xff]  }
  0xb3   :  { %1357 = vmatpush1.bf16.msra.mxu0 %v3984_v58  ;;  %v4088_v58 = vld [vmem:[#allocation5 + $0x4bc] ss:$24 sps:$4 sm:$0xff]  }
  0xb4   :  { %1358 = vmatprep.subr.bf16.mxu0 %v3989_v59  ;;  %v4086_v59 = vld [vmem:[#allocation5 + $0x4b8] ss:$24 sps:$4 sm:$0xff]  }
  0xb7   :  { %1359 = vmatpush1.bf16.msra.mxu0 %v3987_v60  ;;  %v4091_v60 = vld [vmem:[#allocation5 + $0x4ec] ss:$24 sps:$4 sm:$0xff]  }
  0xb8   :  { %1360 = vmatprep.subr.bf16.mxu0 %v3992_v61  ;;  %v4089_v61 = vld [vmem:[#allocation5 + $0x4e8] ss:$24 sps:$4 sm:$0xff]  }
  0xbb   :  { %1361 = vmatpush1.bf16.msra.mxu0 %v3990_v62  ;;  %v4094_v62 = vld [vmem:[#allocation5 + $0x51c] ss:$24 sps:$4 sm:$0xff]  }
  0xbc   :  { %1362 = vmatprep.subr.bf16.mxu0 %v3995_v63  ;;  %v4092_v63 = vld [vmem:[#allocation5 + $0x518] ss:$24 sps:$4 sm:$0xff]  }
  0xbf   :  { %1363 = vmatpush1.bf16.msra.mxu0 %v3993_v0  ;;  %v4097_v0 = vld [vmem:[#allocation5 + $0x54c] ss:$24 sps:$4 sm:$0xff]  }
  0xc0   :  { %1364 = vmatprep.subr.bf16.mxu0 %v4001_v1  ;;  %v4095_v1 = vld [vmem:[#allocation5 + $0x548] ss:$24 sps:$4 sm:$0xff]  }
  0xc3   :  { %1365 = vmatpush1.bf16.msra.mxu0 %v3999_v2  ;;  %v4100_v2 = vld [vmem:[#allocation5 + $0x57c] ss:$24 sps:$4 sm:$0xff]  }
  0xc4   :  { %1366 = vmatprep.subr.bf16.mxu0 %v4004_v3  ;;  %v4098_v3 = vld [vmem:[#allocation5 + $0x578] ss:$24 sps:$4 sm:$0xff]  }
  0xc7   :  { %1367 = vmatpush1.bf16.msra.mxu0 %v4002_v4  ;;  %v4103_v4 = vld [vmem:[#allocation5 + $0x5ac] ss:$24 sps:$4 sm:$0xff]  }
  0xc8   :  { %1389 = vmatprep.subr.bf16.mxu0 %v4010_v5  ;;  %v4101_v5 = vld [vmem:[#allocation5 + $0x5a8] ss:$24 sps:$4 sm:$0xff]  }
  0xca   :  { %1369 = vmatmul.mubr.bf16.vlgmr.msra.gmra.mrb[0].mxu0 %v4742_v6 }
  0xcb   :  { %1390 = vmatpush1.bf16.msra.mxu0 %v4008_v7  ;;  %1378 = vmatprep.mubr.bf16.mxu0 %v4744_v8  ;;  %v4106_v7 = vld [vmem:[#allocation5 + $0x5dc] ss:$24 sps:$4 sm:$0xff]  }
  0xcc   :  { %1391 = vmatprep.subr.bf16.mxu0 %v4013_v9  ;;  %v4104_v9 = vld [vmem:[#allocation5 + $0x5d8] ss:$24 sps:$4 sm:$0xff]  }
  0xcf   :  { %1392 = vmatpush1.bf16.msra.mxu0 %v4011_v10  ;;  %v4109_v10 = vld [vmem:[#allocation5 + $0x14] ss:$24 sps:$4 sm:$0xff]  }
  0xd0   :  { %1393 = vmatprep.subr.bf16.mxu0 %v4019_v11  ;;  %v4107_v11 = vld [vmem:[#allocation5 + $0x10] ss:$24 sps:$4 sm:$0xff]  }
  0xd2   :  { %1379 = vmatmul.mubr.bf16.gmra.mrb[4].mxu0 %v4748_v12 }
  0xd3   :  { %1394 = vmatpush1.bf16.msra.mxu0 %v4017_v14  ;;  %1421 = vmatprep.mubr.bf16.mxu0 %v4727_v13  ;;  %v4040_v13 = vld [vmem:[#allocation5 + $0x1bc] ss:$24 sps:$4 sm:$0xff]  }
  0xd4   :  { %1395 = vmatprep.subr.bf16.mxu0 %v4022_v15  ;;  %v4112_v14 = vld [vmem:[#allocation5 + $0x44] ss:$24 sps:$4 sm:$0xff]   ;;  %v4110_v15 = vld [vmem:[#allocation5 + $0x40] ss:$24 sps:$4 sm:$0xff]  }
  0xd7   :  { %1396 = vmatpush1.bf16.msra.mxu0 %v4020_v16  ;;  %v4115_v16 = vld [vmem:[#allocation5 + $0x74] ss:$24 sps:$4 sm:$0xff]  }
  0xd8   :  { %1397 = vmatprep.subr.bf16.mxu0 %v4025_v17  ;;  %v4113_v17 = vld [vmem:[#allocation5 + $0x70] ss:$24 sps:$4 sm:$0xff]  }
  0xdb   :  { %1398 = vmatpush1.bf16.msra.mxu0 %v4023_v18  ;;  %v4118_v18 = vld [vmem:[#allocation5 + $0xa4] ss:$24 sps:$4 sm:$0xff]  }
  0xdc   :  { %1399 = vmatprep.subr.bf16.mxu0 %v4028_v19  ;;  %v4116_v19 = vld [vmem:[#allocation5 + $0xa0] ss:$24 sps:$4 sm:$0xff]  }
  0xdf   :  { %1400 = vmatpush1.bf16.msra.mxu0 %v4026_v20  ;;  %v4515_v20 = vld [vmem:[#allocation3 + $0x4] ss:$16 sps:$4 sm:$0xff]  }
  0xe0   :  { %1401 = vmatprep.subr.bf16.mxu0 %v4031_v21  ;;  %v4121_v21 = vld [vmem:[#allocation5 + $0xd4] ss:$24 sps:$4 sm:$0xff]  }
  0xe3   :  { %1402 = vmatpush1.bf16.msra.mxu0 %v4029_v22  ;;  %v4119_v22 = vld [vmem:[#allocation5 + $0xd0] ss:$24 sps:$4 sm:$0xff]  }
  0xe4   :  { %1403 = vmatprep.subr.bf16.mxu0 %v4034_v23  ;;  %v4124_v23 = vld [vmem:[#allocation5 + $0x104] ss:$24 sps:$4 sm:$0xff]  }
  0xe7   :  { %1404 = vmatpush1.bf16.msra.mxu0 %v4032_v24  ;;  %v4122_v24 = vld [vmem:[#allocation5 + $0x100] ss:$24 sps:$4 sm:$0xff]  }
  0xe8   :  { %1405 = vmatprep.subr.bf16.mxu0 %v4037_v25  ;;  %v4127_v25 = vld [vmem:[#allocation5 + $0x134] ss:$24 sps:$4 sm:$0xff]  }
  0xeb   :  { %1406 = vmatpush1.bf16.msra.mxu0 %v4035_v26  ;;  %v4125_v26 = vld [vmem:[#allocation5 + $0x130] ss:$24 sps:$4 sm:$0xff]  }
  0xec   :  { %1407 = vmatprep.subr.bf16.mxu0 %v4040_v13  ;;  %v4130_v13 = vld [vmem:[#allocation5 + $0x164] ss:$24 sps:$4 sm:$0xff]  }
  0xef   :  { %1408 = vmatpush1.bf16.msra.mxu0 %v4038_v27  ;;  %v4128_v27 = vld [vmem:[#allocation5 + $0x160] ss:$24 sps:$4 sm:$0xff]  }
  0xf0   :  { %1409 = vmatprep.subr.bf16.mxu0 %v4043_v28  ;;  %v4133_v28 = vld [vmem:[#allocation5 + $0x194] ss:$24 sps:$4 sm:$0xff]  }
  0xf3   :  { %1410 = vmatpush1.bf16.msra.mxu0 %v4041_v29  ;;  %v4131_v29 = vld [vmem:[#allocation5 + $0x190] ss:$24 sps:$4 sm:$0xff]  }
  0xf4   :  { %1411 = vmatprep.subr.bf16.mxu0 %v4046_v30  ;;  %v4136_v30 = vld [vmem:[#allocation5 + $0x1c4] ss:$24 sps:$4 sm:$0xff]  }
  0xf7   :  { %1412 = vmatpush1.bf16.msra.mxu0 %v4044_v31  ;;  %v4134_v31 = vld [vmem:[#allocation5 + $0x1c0] ss:$24 sps:$4 sm:$0xff]  }
  0xf8   :  { %1413 = vmatprep.subr.bf16.mxu0 %v4049_v32  ;;  %v4139_v32 = vld [vmem:[#allocation5 + $0x1f4] ss:$24 sps:$4 sm:$0xff]  }
  0xfb   :  { %1414 = vmatpush1.bf16.msra.mxu0 %v4047_v33  ;;  %v4137_v33 = vld [vmem:[#allocation5 + $0x1f0] ss:$24 sps:$4 sm:$0xff]  }
  0xfc   :  { %1415 = vmatprep.subr.bf16.mxu0 %v4052_v35  ;;  %v4142_v35 = vld [vmem:[#allocation5 + $0x224] ss:$24 sps:$4 sm:$0xff]  }
  0xff   :  { %1416 = vmatpush1.bf16.msra.mxu0 %v4050_v37  ;;  %v4140_v37 = vld [vmem:[#allocation5 + $0x220] ss:$24 sps:$4 sm:$0xff]  }
 0x100   :  { %1417 = vmatprep.subr.bf16.mxu0 %v4055_v38  ;;  %v4145_v38 = vld [vmem:[#allocation5 + $0x254] ss:$24 sps:$4 sm:$0xff]  }
 0x103   :  { %1418 = vmatpush1.bf16.msra.mxu0 %v4053_v39  ;;  %v4143_v39 = vld [vmem:[#allocation5 + $0x250] ss:$24 sps:$4 sm:$0xff]  }
 0x104   :  { %1419 = vmatprep.subr.bf16.mxu0 %v4058_v41  ;;  %v4148_v41 = vld [vmem:[#allocation5 + $0x284] ss:$24 sps:$4 sm:$0xff]  }
 0x107   :  { %1420 = vmatpush1.bf16.msra.mxu0 %v4056_v43  ;;  %v4146_v43 = vld [vmem:[#allocation5 + $0x280] ss:$24 sps:$4 sm:$0xff]  }
 0x108   :  { %1442 = vmatprep.subr.bf16.mxu0 %v4061_v44  ;;  %v4151_v44 = vld [vmem:[#allocation5 + $0x2b4] ss:$24 sps:$4 sm:$0xff]  }
 0x10a   :  { %1422 = vmatmul.mubr.bf16.vlgmr.msra.gmra.mrb[8].mxu0 %v4730_v34  ;;  %v4071_v34 = vld [vmem:[#allocation5 + $0x3c8] ss:$24 sps:$4 sm:$0xff]  }
 0x10b   :  { %1443 = vmatpush1.bf16.msra.mxu0 %v4059_v45  ;;  %1431 = vmatprep.mubr.bf16.mxu0 %v4732_v36  ;;  %v4074_v36 = vld [vmem:[#allocation5 + $0x3f8] ss:$24 sps:$4 sm:$0xff]  }
 0x10c   :  { %1444 = vmatprep.subr.bf16.mxu0 %v4064_v46  ;;  %v4149_v45 = vld [vmem:[#allocation5 + $0x2b0] ss:$24 sps:$4 sm:$0xff]   ;;  %v4154_v46 = vld [vmem:[#allocation5 + $0x2e4] ss:$24 sps:$4 sm:$0xff]  }
 0x10f   :  { %1445 = vmatpush1.bf16.msra.mxu0 %v4062_v47  ;;  %v4152_v47 = vld [vmem:[#allocation5 + $0x2e0] ss:$24 sps:$4 sm:$0xff]  }
 0x110   :  { %1446 = vmatprep.subr.bf16.mxu0 %v4067_v48  ;;  %v4157_v48 = vld [vmem:[#allocation5 + $0x314] ss:$24 sps:$4 sm:$0xff]  }
 0x112   :  { %1432 = vmatmul.mubr.bf16.gmra.mrb[12].mxu0 %v4736_v40  ;;  %v4080_v40 = vld [vmem:[#allocation5 + $0x458] ss:$24 sps:$4 sm:$0xff]  }
 0x113   :  { %1447 = vmatpush1.bf16.msra.mxu0 %v4065_v49  ;;  %1474 = vmatprep.mubr.bf16.mxu0 %v4738_v42  ;;  %v4083_v42 = vld [vmem:[#allocation5 + $0x488] ss:$24 sps:$4 sm:$0xff]  }
 0x114   :  { %1448 = vmatprep.subr.bf16.mxu0 %v4070_v50  ;;  %v4155_v49 = vld [vmem:[#allocation5 + $0x310] ss:$24 sps:$4 sm:$0xff]   ;;  %v4160_v50 = vld [vmem:[#allocation5 + $0x344] ss:$24 sps:$4 sm:$0xff]  }
 0x117   :  { %1449 = vmatpush1.bf16.msra.mxu0 %v4068_v51  ;;  %v4516_v51 = vld [vmem:[#allocation3] ss:$16 sps:$4 sm:$0xff]  }
 0x118   :  { %1450 = vmatprep.subr.bf16.mxu0 %v4073_v52  ;;  %v4158_v52 = vld [vmem:[#allocation5 + $0x340] ss:$24 sps:$4 sm:$0xff]  }
 0x11b   :  { %1451 = vmatpush1.bf16.msra.mxu0 %v4071_v34  ;;  %v4517_v34 = vld [vmem:[#allocation3 + $0x24] ss:$16 sps:$4 sm:$0xff]  }
 0x11c   :  { %1452 = vmatprep.subr.bf16.mxu0 %v4076_v53  ;;  %v4163_v53 = vld [vmem:[#allocation5 + $0x374] ss:$24 sps:$4 sm:$0xff]  }
 0x11f   :  { %1453 = vmatpush1.bf16.msra.mxu0 %v4074_v36  ;;  %v4161_v36 = vld [vmem:[#allocation5 + $0x370] ss:$24 sps:$4 sm:$0xff]  }
 0x120   :  { %1454 = vmatprep.subr.bf16.mxu0 %v4079_v54  ;;  %v4166_v54 = vld [vmem:[#allocation5 + $0x3a4] ss:$24 sps:$4 sm:$0xff]  }
 0x123   :  { %1455 = vmatpush1.bf16.msra.mxu0 %v4077_v55  ;;  %v4518_v55 = vld [vmem:[#allocation3 + $0x20] ss:$16 sps:$4 sm:$0xff]  }
 0x124   :  { %1456 = vmatprep.subr.bf16.mxu0 %v4082_v56  ;;  %v4164_v56 = vld [vmem:[#allocation5 + $0x3a0] ss:$24 sps:$4 sm:$0xff]  }
 0x127   :  { %1457 = vmatpush1.bf16.msra.mxu0 %v4080_v40  ;;  %v4519_v40 = vld [vmem:[#allocation3 + $0xc] ss:$16 sps:$4 sm:$0xff]  }
 0x128   :  { %1458 = vmatprep.subr.bf16.mxu0 %v4085_v57  ;;  %v4169_v57 = vld [vmem:[#allocation5 + $0x3d4] ss:$24 sps:$4 sm:$0xff]  }
 0x12b   :  { %1459 = vmatpush1.bf16.msra.mxu0 %v4083_v42  ;;  %v4167_v42 = vld [vmem:[#allocation5 + $0x3d0] ss:$24 sps:$4 sm:$0xff]  }
 0x12c   :  { %1460 = vmatprep.subr.bf16.mxu0 %v4088_v58  ;;  %v4172_v58 = vld [vmem:[#allocation5 + $0x404] ss:$24 sps:$4 sm:$0xff]  }
 0x12f   :  { %1461 = vmatpush1.bf16.msra.mxu0 %v4086_v59  ;;  %v4170_v59 = vld [vmem:[#allocation5 + $0x400] ss:$24 sps:$4 sm:$0xff]  }
 0x130   :  { %1462 = vmatprep.subr.bf16.mxu0 %v4091_v60  ;;  %v4175_v60 = vld [vmem:[#allocation5 + $0x434] ss:$24 sps:$4 sm:$0xff]  }
 0x133   :  { %1463 = vmatpush1.bf16.msra.mxu0 %v4089_v61 }
 0x134   :  { %1464 = vmatprep.subr.bf16.mxu0 %v4094_v62 }
 0x137   :  { %1465 = vmatpush1.bf16.msra.mxu0 %v4092_v63 }
 0x138   :  { %1466 = vmatprep.subr.bf16.mxu0 %v4097_v0  ;;  %v4173_v0 = vld [vmem:[#allocation5 + $0x430] ss:$24 sps:$4 sm:$0xff]  }
 0x13b   :  { %1467 = vmatpush1.bf16.msra.mxu0 %v4095_v1 }
 0x13c   :  { %1468 = vmatprep.subr.bf16.mxu0 %v4100_v2  ;;  %v4178_v2 = vld [vmem:[#allocation5 + $0x464] ss:$24 sps:$4 sm:$0xff]  }
 0x13f   :  { %1469 = vmatpush1.bf16.msra.mxu0 %v4098_v3  ;;  %v4176_v3 = vld [vmem:[#allocation5 + $0x460] ss:$24 sps:$4 sm:$0xff]  }
 0x140   :  { %1470 = vmatprep.subr.bf16.mxu0 %v4103_v4  ;;  %v4181_v4 = vld [vmem:[#allocation5 + $0x494] ss:$24 sps:$4 sm:$0xff]  }
 0x143   :  { %1471 = vmatpush1.bf16.msra.mxu0 %v4101_v5 }
 0x144   :  { %1472 = vmatprep.subr.bf16.mxu0 %v4106_v7 }
 0x147   :  { %1473 = vmatpush1.bf16.msra.mxu0 %v4104_v9 }
 0x148   :  { %1495 = vmatprep.subr.bf16.mxu0 %v4109_v10  ;;  %v4179_v10 = vld [vmem:[#allocation5 + $0x490] ss:$24 sps:$4 sm:$0xff]  }
 0x14a   :  { %1475 = vmatmul.mubr.bf16.vlgmr.msra.gmra.mrb[8].mxu0 %v4742_v6 }
 0x14b   :  { %1496 = vmatpush1.bf16.msra.mxu0 %v4107_v11  ;;  %1484 = vmatprep.mubr.bf16.mxu0 %v4744_v8 }
 0x14c   :  { %1497 = vmatprep.subr.bf16.mxu0 %v4112_v14  ;;  %v4184_v14 = vld [vmem:[#allocation5 + $0x4c4] ss:$24 sps:$4 sm:$0xff]  }
 0x14f   :  { %1498 = vmatpush1.bf16.msra.mxu0 %v4110_v15  ;;  %v4182_v15 = vld [vmem:[#allocation5 + $0x4c0] ss:$24 sps:$4 sm:$0xff]  }
 0x150   :  { %1499 = vmatprep.subr.bf16.mxu0 %v4115_v16  ;;  %v4187_v16 = vld [vmem:[#allocation5 + $0x4f4] ss:$24 sps:$4 sm:$0xff]  }
 0x152   :  { %1485 = vmatmul.mubr.bf16.gmra.mrb[12].mxu0 %v4748_v12 }
 0x153   :  { %1500 = vmatpush1.bf16.msra.mxu0 %v4113_v17  ;;  %1527 = vmatprep.mubr.bf16.mxu0 %v4515_v20  ;;  %v4185_v17 = vld [vmem:[#allocation5 + $0x4f0] ss:$24 sps:$4 sm:$0xff]   ;;  %v4193_v20 = vld [vmem:[#allocation5 + $0x554] ss:$24 sps:$4 sm:$0xff]  }
 0x154   :  { %1501 = vmatprep.subr.bf16.mxu0 %v4118_v18  ;;  %v4190_v18 = vld [vmem:[#allocation5 + $0x524] ss:$24 sps:$4 sm:$0xff]  }
 0x157   :  { %1502 = vmatpush1.bf16.msra.mxu0 %v4116_v19  ;;  %v4188_v19 = vld [vmem:[#allocation5 + $0x520] ss:$24 sps:$4 sm:$0xff]  }
 0x158   :  { %1503 = vmatprep.subr.bf16.mxu0 %v4121_v21  ;;  %v4191_v21 = vld [vmem:[#allocation5 + $0x550] ss:$24 sps:$4 sm:$0xff]  }
 0x15b   :  { %1504 = vmatpush1.bf16.msra.mxu0 %v4119_v22  ;;  %v4196_v22 = vld [vmem:[#allocation5 + $0x584] ss:$24 sps:$4 sm:$0xff]  }
 0x15c   :  { %1505 = vmatprep.subr.bf16.mxu0 %v4124_v23  ;;  %v4194_v23 = vld [vmem:[#allocation5 + $0x580] ss:$24 sps:$4 sm:$0xff]  }
 0x15f   :  { %1506 = vmatpush1.bf16.msra.mxu0 %v4122_v24  ;;  %v4199_v24 = vld [vmem:[#allocation5 + $0x5b4] ss:$24 sps:$4 sm:$0xff]  }
 0x160   :  { %1507 = vmatprep.subr.bf16.mxu0 %v4127_v25  ;;  %v4197_v25 = vld [vmem:[#allocation5 + $0x5b0] ss:$24 sps:$4 sm:$0xff]  }
 0x163   :  { %1508 = vmatpush1.bf16.msra.mxu0 %v4125_v26  ;;  %v4202_v26 = vld [vmem:[#allocation5 + $0x5e4] ss:$24 sps:$4 sm:$0xff]  }
 0x164   :  { %1509 = vmatprep.subr.bf16.mxu0 %v4130_v13  ;;  %v4200_v13 = vld [vmem:[#allocation5 + $0x5e0] ss:$24 sps:$4 sm:$0xff]  }
 0x167   :  { %1510 = vmatpush1.bf16.msra.mxu0 %v4128_v27  ;;  %v4203_v27 = vld [vmem:[#allocation8 + $0x4] ss:$16 sps:$4 sm:$0xff]  }
 0x168   :  { %1511 = vmatprep.subr.bf16.mxu0 %v4133_v28  ;;  %v4205_v28 = vld [vmem:[#allocation8] ss:$16 sps:$4 sm:$0xff]   ;;  %2437 = vmatprep.subr.bf16.mxu1 %v4203_v27 }
 0x169   :  { %2438 = vmatpush1.bf16.msra.mxu1 %v4205_v28 }
 0x16b   :  { %1512 = vmatpush1.bf16.msra.mxu0 %v4131_v29  ;;  %v4206_v29 = vld [vmem:[#allocation8 + $0x24] ss:$16 sps:$4 sm:$0xff]  }
 0x16c   :  { %1513 = vmatprep.subr.bf16.mxu0 %v4136_v30  ;;  %v4208_v30 = vld [vmem:[#allocation8 + $0x20] ss:$16 sps:$4 sm:$0xff]   ;;  %2439 = vmatprep.subr.bf16.mxu1 %v4206_v29  ;;  %v4242_v29 = vld [vmem:[#allocation8 + $0x1a4] ss:$16 sps:$4 sm:$0xff]  }
 0x16d   :  { %2440 = vmatpush1.bf16.msra.mxu1 %v4208_v30 }
 0x16f   :  { %1514 = vmatpush1.bf16.msra.mxu0 %v4134_v31  ;;  %v4209_v31 = vld [vmem:[#allocation8 + $0x44] ss:$16 sps:$4 sm:$0xff]  }
 0x170   :  { %1515 = vmatprep.subr.bf16.mxu0 %v4139_v32  ;;  %v4211_v32 = vld [vmem:[#allocation8 + $0x40] ss:$16 sps:$4 sm:$0xff]   ;;  %2441 = vmatprep.subr.bf16.mxu1 %v4209_v31 }
 0x171   :  { %2442 = vmatpush1.bf16.msra.mxu1 %v4211_v32  ;;  %v4244_v31 = vld [vmem:[#allocation8 + $0x1a0] ss:$16 sps:$4 sm:$0xff]  }
 0x173   :  { %1516 = vmatpush1.bf16.msra.mxu0 %v4137_v33  ;;  %v4212_v33 = vld [vmem:[#allocation8 + $0x64] ss:$16 sps:$4 sm:$0xff]  }
 0x174   :  { %1517 = vmatprep.subr.bf16.mxu0 %v4142_v35  ;;  %v4214_v35 = vld [vmem:[#allocation8 + $0x60] ss:$16 sps:$4 sm:$0xff]   ;;  %2443 = vmatprep.subr.bf16.mxu1 %v4212_v33 }
 0x175   :  { %2444 = vmatpush1.bf16.msra.mxu1 %v4214_v35 }
 0x177   :  { %1518 = vmatpush1.bf16.msra.mxu0 %v4140_v37  ;;  %v4215_v37 = vld [vmem:[#allocation8 + $0x84] ss:$16 sps:$4 sm:$0xff]  }
 0x178   :  { %1519 = vmatprep.subr.bf16.mxu0 %v4145_v38  ;;  %v4217_v38 = vld [vmem:[#allocation8 + $0x80] ss:$16 sps:$4 sm:$0xff]   ;;  %2445 = vmatprep.subr.bf16.mxu1 %v4215_v37  ;;  %v4245_v37 = vld [vmem:[#allocation8 + $0x1c4] ss:$16 sps:$4 sm:$0xff]  }
 0x179   :  { %2446 = vmatpush1.bf16.msra.mxu1 %v4217_v38 }
 0x17b   :  { %1520 = vmatpush1.bf16.msra.mxu0 %v4143_v39  ;;  %v4218_v39 = vld [vmem:[#allocation8 + $0xa4] ss:$16 sps:$4 sm:$0xff]  }
 0x17c   :  { %1521 = vmatprep.subr.bf16.mxu0 %v4148_v41  ;;  %v4220_v41 = vld [vmem:[#allocation8 + $0xa0] ss:$16 sps:$4 sm:$0xff]   ;;  %2447 = vmatprep.subr.bf16.mxu1 %v4218_v39 }
 0x17d   :  { %2448 = vmatpush1.bf16.msra.mxu1 %v4220_v41  ;;  %v4247_v41 = vld [vmem:[#allocation8 + $0x1c0] ss:$16 sps:$4 sm:$0xff]  }
 0x17f   :  { %1522 = vmatpush1.bf16.msra.mxu0 %v4146_v43  ;;  %v4224_v43 = vld [vmem:[#allocation8 + $0xe4] ss:$16 sps:$4 sm:$0xff]  }
 0x180   :  { %1523 = vmatprep.subr.bf16.mxu0 %v4151_v44  ;;  %v4226_v44 = vld [vmem:[#allocation8 + $0xe0] ss:$16 sps:$4 sm:$0xff]  }
 0x183   :  { %1524 = vmatpush1.bf16.msra.mxu0 %v4149_v45  ;;  %v4227_v45 = vld [vmem:[#allocation8 + $0x104] ss:$16 sps:$4 sm:$0xff]  }
 0x184   :  { %1525 = vmatprep.subr.bf16.mxu0 %v4154_v46  ;;  %v4229_v46 = vld [vmem:[#allocation8 + $0x100] ss:$16 sps:$4 sm:$0xff]  }
 0x187   :  { %1526 = vmatpush1.bf16.msra.mxu0 %v4152_v47 }
 0x188   :  { %1548 = vmatprep.subr.bf16.mxu0 %v4157_v48 }
 0x18a   :  { %1528 = vmatmul.mubr.bf16.vlgmr.msra.gmra.mrb[16].mxu0 %v4516_v51  ;;  %v4230_v51 = vld [vmem:[#allocation8 + $0x124] ss:$16 sps:$4 sm:$0xff]  }
 0x18b   :  { %1549 = vmatpush1.bf16.msra.mxu0 %v4155_v49  ;;  %1537 = vmatprep.mubr.bf16.mxu0 %v4517_v34  ;;  %v4232_v34 = vld [vmem:[#allocation8 + $0x120] ss:$16 sps:$4 sm:$0xff]  }
 0x18c   :  { %1550 = vmatprep.subr.bf16.mxu0 %v4160_v50 }
 0x18f   :  { %1551 = vmatpush1.bf16.msra.mxu0 %v4158_v52 }
 0x190   :  { %1552 = vmatprep.subr.bf16.mxu0 %v4163_v53 }
 0x192   :  { %1538 = vmatmul.mubr.bf16.gmra.mrb[20].mxu0 %v4518_v55  ;;  %v1678_v55 = vlaneseq }
 0x193   :  { %1553 = vmatpush1.bf16.msra.mxu0 %v4161_v36  ;;  %1580 = vmatprep.mubr.bf16.mxu0 %v4519_v40 }
 0x194   :  { %1554 = vmatprep.subr.bf16.mxu0 %v4166_v54 }
 0x197   :  { %1555 = vmatpush1.bf16.msra.mxu0 %v4164_v56 }
 0x198   :  { %1556 = vmatprep.subr.bf16.mxu0 %v4169_v57  ;;  %v4233_v57 = vld [vmem:[#allocation8 + $0x144] ss:$16 sps:$4 sm:$0xff]  }
 0x19b   :  { %1557 = vmatpush1.bf16.msra.mxu0 %v4167_v42  ;;  %v4235_v42 = vld [vmem:[#allocation8 + $0x140] ss:$16 sps:$4 sm:$0xff]  }
 0x19c   :  { %1558 = vmatprep.subr.bf16.mxu0 %v4172_v58 }
 0x19d   :  { %v4759_v61 = vpop.f32.mrb[0].mxu0 }
 0x19e   :  { %v4761_v62 = vpop.f32.mrb[1].mxu0  ;;  %v1601_v48 = vmul.f32 %v4759_v61, %v4759_v61 }
 0x19f   :  { %v4763_v63 = vpop.f32.mrb[2].mxu0  ;;  %1559 = vmatpush1.bf16.msra.mxu0 %v4170_v59 }
 0x1a0   :  { %v4765_v1 = vpop.f32.mrb[3].mxu0  ;;  %1560 = vmatprep.subr.bf16.mxu0 %v4175_v60  ;;  %v1604_v53 = vmul.f32 %v4763_v63, %v4763_v63  ;;  %v4796_v60 = vshrl.u32 %v1678_v55, 7 }
 0x1a3   :  { %1561 = vmatpush1.bf16.msra.mxu0 %v4173_v0 }
 0x1a4   :  { %1562 = vmatprep.subr.bf16.mxu0 %v4178_v2 }
 0x1a5   :  { %v4767_v5 = vpop.f32.mrb[4].mxu0 }
 0x1a6   :  { %v4769_v7 = vpop.f32.mrb[5].mxu0  ;;  %v1607_v2 = vmul.f32 %v4767_v5, %v4767_v5 }
 0x1a7   :  { %v4771_v9 = vpop.f32.mrb[6].mxu0  ;;  %1563 = vmatpush1.bf16.msra.mxu0 %v4176_v3  ;;  %v1673_v3 = vld [vmem:[%s4990_s5] sm:$0x7] }
 0x1a8   :  { %v4773_v11 = vpop.f32.mrb[7].mxu0  ;;  %1564 = vmatprep.subr.bf16.mxu0 %v4181_v4  ;;  %v1675_v4 = vstv %s4985_s0 }
 0x1ab   :  { %1565 = vmatpush1.bf16.msra.mxu0 %v4179_v10 }
 0x1ac   :  { %1566 = vmatprep.subr.bf16.mxu0 %v4184_v14 }
 0x1af   :  { %1567 = vmatpush1.bf16.msra.mxu0 %v4182_v15  ;;  %v4236_v15 = vld [vmem:[#allocation8 + $0x164] ss:$16 sps:$4 sm:$0xff]  }
 0x1b0   :  { %1568 = vmatprep.subr.bf16.mxu0 %v4187_v16 }
 0x1b3   :  { %1569 = vmatpush1.bf16.msra.mxu0 %v4185_v17  ;;  %v4238_v17 = vld [vmem:[#allocation8 + $0x160] ss:$16 sps:$4 sm:$0xff]  }
 0x1b4   :  { %1570 = vmatprep.subr.bf16.mxu0 %v4190_v18  ;;  %v1610_v18 = vmul.f32 %v4771_v9, %v4771_v9 }
 0x1b7   :  { %1571 = vmatpush1.bf16.msra.mxu0 %v4188_v19 }
 0x1b8   :  { %1572 = vmatprep.subr.bf16.mxu0 %v4193_v20 }
 0x1bb   :  { %1573 = vmatpush1.bf16.msra.mxu0 %v4191_v21  ;;  %v4814_v21 = vmul.f32 %v1675_v4, %v1673_v3 }
 0x1bc   :  { %1574 = vmatprep.subr.bf16.mxu0 %v4196_v22  ;;  %v1680_v22 = vsub.s32 0, %v4796_v60 }
 0x1be   :  { %v1681_v27 = vrot.slane %v4814_v21, %v1680_v22 }
 0x1bf   :  { %1575 = vmatpush1.bf16.msra.mxu0 %v4194_v23 }
 0x1c0   :  { %1576 = vmatprep.subr.bf16.mxu0 %v4199_v24 }
 0x1c3   :  { %1577 = vmatpush1.bf16.msra.mxu0 %v4197_v25  ;;  %v4239_v25 = vld [vmem:[#allocation8 + $0x184] ss:$16 sps:$4 sm:$0xff]  }
 0x1c4   :  { %1578 = vmatprep.subr.bf16.mxu0 %v4202_v26  ;;  %v4241_v26 = vld [vmem:[#allocation8 + $0x180] ss:$16 sps:$4 sm:$0xff]  }
 0x1c7   :  { %1579 = vmatpush1.bf16.msra.mxu0 %v4200_v13 }
 0x1ca   :  { %1581 = vmatmul.mubr.bf16.vlgmr.msra.gmra.mrb[16].mxu0 %v4742_v6  ;;  %v4221_v6 = vld [vmem:[#allocation8 + $0xc4] ss:$16 sps:$4 sm:$0xff]  }
 0x1cb   :  { %1590 = vmatprep.mubr.bf16.mxu0 %v4744_v8  ;;  %v4223_v8 = vld [vmem:[#allocation8 + $0xc0] ss:$16 sps:$4 sm:$0xff]   ;;  %2449 = vmatprep.subr.bf16.mxu1 %v4221_v6 }
 0x1cc   :  { %2450 = vmatpush1.bf16.msra.mxu1 %v4223_v8 }
 0x1cd   :  { %2451 = vmatprep.subr.bf16.mxu1 %v4224_v43 }
 0x1d0   :  { %2452 = vmatpush1.bf16.msra.mxu1 %v4226_v44  ;;  %v4248_v44 = vld [vmem:[#allocation8 + $0x1e4] ss:$16 sps:$4 sm:$0xff]  }
 0x1d1   :  { %2453 = vmatprep.subr.bf16.mxu1 %v4227_v45 }
 0x1d2   :  { %1591 = vmatmul.mubr.bf16.gmra.mrb[20].mxu0 %v4748_v12 }
 0x1d4   :  { %2454 = vmatpush1.bf16.msra.mxu1 %v4229_v46 }
 0x1d5   :  { %2455 = vmatprep.subr.bf16.mxu1 %v4230_v51  ;;  %v4250_v51 = vld [vmem:[#allocation8 + $0x1e0] ss:$16 sps:$4 sm:$0xff]  }
 0x1d8   :  { %2456 = vmatpush1.bf16.msra.mxu1 %v4232_v34 }
 0x1d9   :  { %2457 = vmatprep.subr.bf16.mxu1 %v4233_v57 }
 0x1dc   :  { %2458 = vmatpush1.bf16.msra.mxu1 %v4235_v42 }
 0x1dd   :  { %2459 = vmatprep.subr.bf16.mxu1 %v4236_v15 }
 0x1e0   :  { %2460 = vmatpush1.bf16.msra.mxu1 %v4238_v17 }
 0x1e1   :  { %2461 = vmatprep.subr.bf16.mxu1 %v4239_v25 }
 0x1e4   :  { %2462 = vmatpush1.bf16.msra.mxu1 %v4241_v26 }
 0x1e5   :  { %2463 = vmatprep.subr.bf16.mxu1 %v4242_v29 }
 0x1e8   :  { %2464 = vmatpush1.bf16.msra.mxu1 %v4244_v31 }
 0x1e9   :  { %2465 = vmatprep.subr.bf16.mxu1 %v4245_v37 }
 0x1ec   :  { %2466 = vmatpush1.bf16.msra.mxu1 %v4247_v41 }
 0x1ed   :  { %2467 = vmatprep.subr.bf16.mxu1 %v4248_v44 }
 0x1f0   :  { %2468 = vmatpush1.bf16.msra.mxu1 %v4250_v51 }
 0x21d   :  { %v4778_v47 = vpop.f32.mrb[8].mxu0 }
 0x21e   :  { %v4780_v12 = vpop.f32.mrb[9].mxu0 }
 0x21f   :  { %v1613_v49 = vmul.f32 %v4780_v12, %v4780_v12  ;;  %v4786_v50 = vpop.f32.mrb[10].mxu0 }
 0x220   :  { %v4788_v52 = vpop.f32.mrb[11].mxu0  ;;  %v1606_v25 = vmul.f32 %v4786_v50, %v4786_v50 }
 0x221   :  { %v1625_v36 = vadd.f32 %v1613_v49, %v1601_v48  ;;  %v1616_v54 = vmul.f32 %v4788_v52, %v4788_v52 }
 0x223   :  { %v1637_v56 = vmax.f32 %v1625_v36, 1.1754944e-38  ;;  %v1628_v40 = vadd.f32 %v1616_v54, %v1604_v53 }
 0x225   :  { %4491 = vrsqrt.f32 %v1637_v56  ;;  %v1640_v58 = vmax.f32 %v1628_v40, 1.1754944e-38  ;;  %v4794_v59 = vpop.f32.mrb[12].mxu0  ;;  %v4253_v56 = vld [vmem:[#allocation8 + $0x204] ss:$16 sps:$4 sm:$0xff]  }
 0x226   :  { %v4798_v0 = vpop.f32.mrb[13].mxu0  ;;  %2490 = vmatprep.subr.bf16.mxu1 %v4253_v56 }
 0x227   :  { %4493 = vrsqrt.f32 %v1640_v58  ;;  %v1619_v10 = vmul.f32 %v4798_v0, %v4798_v0  ;;  %v4810_v14 = vpop.f32.mrb[14].mxu0 }
 0x228   :  { %v1492_v16 = vpop.f32.mrb[15].mxu0 }
 0x229   :  { %v1631_v19 = vadd.f32 %v1619_v10, %v1607_v2  ;;  %v1622_v20 = vmul.f32 %v1492_v16, %v1492_v16 }
 0x22b   :  { %v1643_v23 = vmax.f32 %v1631_v19, 1.1754944e-38  ;;  %v1634_v24 = vadd.f32 %v1622_v20, %v1610_v18  ;;  %v1602_v18 = vmul.f32 %v4761_v62, %v4761_v62 }
 0x22d   :  { %4495 = vrsqrt.f32 %v1643_v23  ;;  %v1646_v13 = vmax.f32 %v1634_v24, 1.1754944e-38 }
 0x22f   :  { %v4492_v28 = vpop.eup %4491  ;;  %4497 = vrsqrt.f32 %v1646_v13 }
 0x230   :  { %v1661_v30 = vmul.f32 %v4492_v28, %v1625_v36 }
 0x231   :  { %v4494_v32 = vpop.eup %4493 }
 0x232   :  { %v1693_v33 = vsub.f32 %v1661_v30, %v1681_v27  ;;  %v1664_v35 = vmul.f32 %v4494_v32, %v1628_v40 }
 0x234   :  { %v1705_v38 = vmax.f32 %v1693_v33, 0.0  ;;  %v1696_v39 = vsub.f32 %v1664_v35, %v1681_v27  ;;  %v1608_v35 = vmul.f32 %v4769_v7, %v4769_v7 }
 0x236   :  { %v1717_v6 = vmul.f32 %v4492_v28, %v1705_v38  ;;  %v1708_v8 = vmax.f32 %v1696_v39, 0.0  ;;  %v1609_v39 = vmul.f32 %v4794_v59, %v4794_v59 }
 0x237   :  { %v4496_v43 = vpop.eup %4495 }
 0x238   :  { %v1729_v45 = vmul.f32 %v1717_v6, %v4759_v61  ;;  %v1747_v46 = vmul.f32 %v1717_v6, %v4780_v12  ;;  %v1720_v48 = vmul.f32 %v4494_v32, %v1708_v8  ;;  %v1667_v49 = vmul.f32 %v4496_v43, %v1631_v19 }
 0x239   :  { %v4498_v34 = vpop.eup %4497  ;;  %v1611_v8 = vmul.f32 %v4773_v11, %v4773_v11 }
 0x23a   :  { %v1732_v53 = vmul.f32 %v1720_v48, %v4763_v63  ;;  %v1750_v36 = vmul.f32 %v1720_v48, %v4788_v52  ;;  %v1699_v54 = vsub.f32 %v1667_v49, %v1681_v27  ;;  %v1670_v55 = vmul.f32 %v4498_v34, %v1634_v24 }
 0x23b   :  { %v1684_v48 = vsub.s32 1, %v4796_v60 }
 0x23c   :  { %v4822_v40 = vpack.c.bf16 %v1732_v53, %v1729_v45  ;;  %v4824_v57 = vpack.c.bf16 %v1750_v36, %v1747_v46  ;;  %v1711_v61 = vmax.f32 %v1699_v54, 0.0  ;;  %v1702_v42 = vsub.f32 %v1670_v55, %v1681_v27 }
 0x23d   :  { %v1612_v46 = vmul.f32 %v4810_v14, %v4810_v14 }
 0x23e   :  { %v1723_v12 = vmul.f32 %v4496_v43, %v1711_v61  ;;  %v1714_v58 = vmax.f32 %v1702_v42, 0.0  ;;  %v1685_v61 = vrot.slane %v4814_v21, %v1684_v48 }
 0x240   :  { %v1735_v2 = vmul.f32 %v1723_v12, %v4767_v5  ;;  %v1753_v3 = vmul.f32 %v1723_v12, %v4798_v0  ;;  %v1726_v63 = vmul.f32 %v4498_v34, %v1714_v58  ;;  %v1603_v5 = vmul.f32 %v4778_v47, %v4778_v47 }
 0x241   :  { %v1688_v34 = vsub.s32 2, %v4796_v60 }
 0x242   :  { %v1738_v52 = vmul.f32 %v1726_v63, %v4771_v9  ;;  %v1756_v4 = vmul.f32 %v1726_v63, %v1492_v16  ;;  %v1605_v16 = vmul.f32 %v4765_v1, %v4765_v1 }
 0x243   :  { %v1689_v58 = vrot.slane %v4814_v21, %v1688_v34 }
 0x244   :  { %v4829_v10 = vpack.c.bf16 %v1756_v4, %v1753_v3  ;;  %v4831_v15 = vpack.c.bf16 %v1738_v52, %v1735_v2 }
 0x29d   :  { %v4833_v17 = vpop.f32.mrb[16].mxu0 }
 0x29e   :  { %v1614_v19 = vmul.f32 %v4833_v17, %v4833_v17  ;;  %v4839_v20 = vpop.f32.mrb[17].mxu0 }
 0x29f   :  { %v1615_v9 = vmul.f32 %v4839_v20, %v4839_v20  ;;  %v4845_v0 = vpop.f32.mrb[18].mxu0 }
 0x2a0   :  { %v1626_v22 = vadd.f32 %v1614_v19, %v1602_v18  ;;  %v1617_v23 = vmul.f32 %v4845_v0, %v4845_v0  ;;  %v4851_v24 = vpop.f32.mrb[19].mxu0 }
 0x2a1   :  { %v1627_v26 = vadd.f32 %v1615_v9, %v1603_v5  ;;  %v1618_v13 = vmul.f32 %v4851_v24, %v4851_v24 }
 0x2a2   :  { %v1638_v27 = vmax.f32 %v1626_v22, 1.1754944e-38  ;;  %v1629_v28 = vadd.f32 %v1617_v23, %v1605_v16 }
 0x2a3   :  { %v1639_v29 = vmax.f32 %v1627_v26, 1.1754944e-38  ;;  %v1630_v30 = vadd.f32 %v1618_v13, %v1606_v25 }
 0x2a4   :  { %4499 = vrsqrt.f32 %v1638_v27  ;;  %v1641_v31 = vmax.f32 %v1629_v28, 1.1754944e-38 }
 0x2a5   :  { %4501 = vrsqrt.f32 %v1639_v29  ;;  %v1642_v32 = vmax.f32 %v1630_v30, 1.1754944e-38  ;;  %v4857_v33 = vpop.f32.mrb[20].mxu0 }
 0x2a6   :  { %4503 = vrsqrt.f32 %v1641_v31  ;;  %v1620_v37 = vmul.f32 %v4857_v33, %v4857_v33  ;;  %v4863_v38 = vpop.f32.mrb[21].mxu0 }
 0x2a7   :  { %4505 = vrsqrt.f32 %v1642_v32  ;;  %v1621_v41 = vmul.f32 %v4863_v38, %v4863_v38  ;;  %v4869_v6 = vpop.f32.mrb[22].mxu0 }
 0x2a8   :  { %v1632_v43 = vadd.f32 %v1620_v37, %v1608_v35  ;;  %v1623_v44 = vmul.f32 %v4869_v6, %v4869_v6  ;;  %v4875_v45 = vpop.f32.mrb[23].mxu0 }
 0x2a9   :  { %v1633_v49 = vadd.f32 %v1621_v41, %v1609_v39  ;;  %v1624_v51 = vmul.f32 %v4875_v45, %v4875_v45 }
 0x2aa   :  { %v1644_v53 = vmax.f32 %v1632_v43, 1.1754944e-38  ;;  %v1635_v36 = vadd.f32 %v1623_v44, %v1611_v8 }
 0x2ab   :  { %v1645_v54 = vmax.f32 %v1633_v49, 1.1754944e-38  ;;  %v1636_v55 = vadd.f32 %v1624_v51, %v1612_v46 }
 0x2ac   :  { %4507 = vrsqrt.f32 %v1644_v53  ;;  %v1647_v56 = vmax.f32 %v1635_v36, 1.1754944e-38 }
 0x2ad   :  { %4509 = vrsqrt.f32 %v1645_v54  ;;  %v1648_v42 = vmax.f32 %v1636_v55, 1.1754944e-38 }
 0x2ae   :  { %v4500_v12 = vpop.eup %4499  ;;  %4511 = vrsqrt.f32 %v1647_v56 }
 0x2af   :  { %v4502_v2 = vpop.eup %4501  ;;  %v1662_v3 = vmul.f32 %v4500_v12, %v1626_v22  ;;  %4513 = vrsqrt.f32 %v1648_v42 }
 0x2b0   :  { %v4504_v63 = vpop.eup %4503  ;;  %v1663_v52 = vmul.f32 %v4502_v2, %v1627_v26 }
 0x2b1   :  { %v4506_v60 = vpop.eup %4505  ;;  %v1694_v4 = vsub.f32 %v1662_v3, %v1685_v61  ;;  %v1665_v18 = vmul.f32 %v4504_v63, %v1629_v28 }
 0x2b2   :  { %v1695_v19 = vsub.f32 %v1663_v52, %v1689_v58  ;;  %v1666_v5 = vmul.f32 %v4506_v60, %v1630_v30  ;;  %v4254_v52 = vld [vmem:[#allocation8 + $0x220] ss:$16 sps:$4 sm:$0xff]  }
 0x2b3   :  { %v1706_v9 = vmax.f32 %v1694_v4, 0.0  ;;  %v1697_v16 = vsub.f32 %v1665_v18, %v1685_v61  ;;  %v4259_v18 = vld [vmem:[#allocation8 + $0x244] ss:$16 sps:$4 sm:$0xff]  }
 0x2b4   :  { %v1707_v23 = vmax.f32 %v1695_v19, 0.0  ;;  %v1698_v25 = vsub.f32 %v1666_v5, %v1689_v58 }
 0x2b5   :  { %v1718_v13 = vmul.f32 %v4500_v12, %v1706_v9  ;;  %v1709_v27 = vmax.f32 %v1697_v16, 0.0 }
 0x2b6   :  { %v4508_v29 = vpop.eup %4507  ;;  %v1719_v31 = vmul.f32 %v4502_v2, %v1707_v23  ;;  %v1710_v21 = vmax.f32 %v1698_v25, 0.0 }
 0x2b7   :  { %v4510_v32 = vpop.eup %4509  ;;  %v1730_v22 = vmul.f32 %v1718_v13, %v4761_v62  ;;  %v1748_v35 = vmul.f32 %v1718_v13, %v4833_v17  ;;  %v1721_v26 = vmul.f32 %v4504_v63, %v1709_v27  ;;  %v1668_v37 = vmul.f32 %v4508_v29, %v1632_v43  ;;  %v4268_v13 = vld [vmem:[#allocation8 + $0x2a4] ss:$16 sps:$4 sm:$0xff]   ;;  %v4266_v27 = vld [vmem:[#allocation8 + $0x2a0] ss:$16 sps:$4 sm:$0xff]  }
 0x2b8   :  { %v4512_v39 = vpop.eup %4511  ;;  %v1731_v28 = vmul.f32 %v1719_v31, %v4778_v47  ;;  %v1749_v30 = vmul.f32 %v1719_v31, %v4839_v20  ;;  %v1722_v41 = vmul.f32 %v4506_v60, %v1710_v21  ;;  %v1669_v8 = vmul.f32 %v4510_v32, %v1633_v49  ;;  %v4251_v20 = vld [vmem:[#allocation8 + $0x200] ss:$16 sps:$4 sm:$0xff]   ;;  %v4274_v21 = vld [vmem:[#allocation8 + $0x2e4] ss:$16 sps:$4 sm:$0xff]  }
 0x2b9   :  { %v4514_v44 = vpop.eup %4513  ;;  %v1733_v46 = vmul.f32 %v1721_v26, %v4765_v1  ;;  %v1751_v48 = vmul.f32 %v1721_v26, %v4845_v0  ;;  %v1700_v51 = vsub.f32 %v1668_v37, %v1685_v61  ;;  %v1671_v34 = vmul.f32 %v4512_v39, %v1635_v36  ;;  %v4256_v36 = vld [vmem:[#allocation8 + $0x224] ss:$16 sps:$4 sm:$0xff]   ;;  %v4269_v31 = vld [vmem:[#allocation8 + $0x2c0] ss:$16 sps:$4 sm:$0xff]   ;;  %v4280_v26 = vld [vmem:[#allocation8 + $0x2c] ss:$16 sps:$4 sm:$0xff]  }
 0x2ba   :  { %v1734_v62 = vmul.f32 %v1722_v41, %v4786_v50  ;;  %v1752_v17 = vmul.f32 %v1722_v41, %v4851_v24  ;;  %v1701_v53 = vsub.f32 %v1669_v8, %v1689_v58  ;;  %v1672_v43 = vmul.f32 %v4514_v44, %v1636_v55  ;;  %v4278_v37 = vld [vmem:[#allocation8 + $0x28] ss:$16 sps:$4 sm:$0xff]   ;;  %v4289_v8 = vld [vmem:[#allocation8 + $0x8c] ss:$16 sps:$4 sm:$0xff]  }
 0x2bb   :  { %v1712_v54 = vmax.f32 %v1700_v51, 0.0  ;;  %v1703_v56 = vsub.f32 %v1671_v34, %v1685_v61  ;;  %v4893_v47 = vpack.c.bf16 %v1751_v48, %v1748_v35  ;;  %v4895_v42 = vpack.c.bf16 %v1733_v46, %v1730_v22  ;;  %v4277_v22 = vld [vmem:[#allocation8 + $0xc] ss:$16 sps:$4 sm:$0xff]   ;;  %v4275_v35 = vld [vmem:[#allocation8 + $0x8] ss:$16 sps:$4 sm:$0xff]  }
 0x2bc   :  { %v4897_v49 = vpack.c.bf16 %v1734_v62, %v1731_v28  ;;  %v4899_v1 = vpack.c.bf16 %v1752_v17, %v1749_v30  ;;  %v1713_v0 = vmax.f32 %v1701_v53, 0.0  ;;  %v1704_v12 = vsub.f32 %v1672_v43, %v1689_v58  ;;  %v4281_v28 = vld [vmem:[#allocation8 + $0x48] ss:$16 sps:$4 sm:$0xff]   ;;  %v4286_v30 = vld [vmem:[#allocation8 + $0x6c] ss:$16 sps:$4 sm:$0xff]  }
 0x2bd   :  { %v1724_v2 = vmul.f32 %v4508_v29, %v1712_v54  ;;  %v1715_v50 = vmax.f32 %v1703_v56, 0.0  ;;  %2469 = vmatprep.mubr.bf16.mxu1 %v4893_v47  ;;  %v4271_v29 = vld [vmem:[#allocation8 + $0x2c4] ss:$16 sps:$4 sm:$0xff]   ;;  %v4284_v41 = vld [vmem:[#allocation8 + $0x68] ss:$16 sps:$4 sm:$0xff]  }
 0x2be   :  { %v1725_v24 = vmul.f32 %v4510_v32, %v1713_v0  ;;  %v1716_v55 = vmax.f32 %v1704_v12, 0.0  ;;  %2470 = vmatmul.mubr.bf16.vlgmr.msra.gmra.mrb[0].mxu1 %v4824_v57  ;;  %v4272_v32 = vld [vmem:[#allocation8 + $0x2e0] ss:$16 sps:$4 sm:$0xff]   ;;  %v4292_v46 = vld [vmem:[#allocation8 + $0xac] ss:$16 sps:$4 sm:$0xff]  }
 0x2bf   :  { %v1736_v61 = vmul.f32 %v1724_v2, %v4769_v7  ;;  %v1754_v3 = vmul.f32 %v1724_v2, %v4857_v33  ;;  %v1727_v63 = vmul.f32 %v4512_v39, %v1715_v50  ;;  %2491 = vmatpush1.bf16.msra.mxu1 %v4251_v20  ;;  %v4257_v33 = vld [vmem:[#allocation8 + $0x240] ss:$16 sps:$4 sm:$0xff]   ;;  %v4283_v39 = vld [vmem:[#allocation8 + $0x4c] ss:$16 sps:$4 sm:$0xff]   ;;  %v4290_v48 = vld [vmem:[#allocation8 + $0xa8] ss:$16 sps:$4 sm:$0xff]  }
 0x2c0   :  { %v1737_v60 = vmul.f32 %v1725_v24, %v4794_v59  ;;  %v1755_v58 = vmul.f32 %v1725_v24, %v4863_v38  ;;  %v1728_v4 = vmul.f32 %v4514_v44, %v1716_v55  ;;  %2492 = vmatprep.subr.bf16.mxu1 %v4256_v36  ;;  %v4262_v38 = vld [vmem:[#allocation8 + $0x264] ss:$16 sps:$4 sm:$0xff]   ;;  %v4287_v44 = vld [vmem:[#allocation8 + $0x88] ss:$16 sps:$4 sm:$0xff]   ;;  %v4295_v51 = vld [vmem:[#allocation8 + $0xcc] ss:$16 sps:$4 sm:$0xff]  }
 0x2c1   :  { %v1739_v19 = vmul.f32 %v1727_v63, %v4773_v11  ;;  %v1757_v5 = vmul.f32 %v1727_v63, %v4869_v6  ;;  %v4260_v11 = vld [vmem:[#allocation8 + $0x260] ss:$16 sps:$4 sm:$0xff]   ;;  %v4265_v6 = vld [vmem:[#allocation8 + $0x284] ss:$16 sps:$4 sm:$0xff]   ;;  %v4293_v34 = vld [vmem:[#allocation8 + $0xc8] ss:$16 sps:$4 sm:$0xff]  }
 0x2c2   :  { %v1740_v9 = vmul.f32 %v1728_v4, %v4810_v14  ;;  %v1758_v7 = vmul.f32 %v1728_v4, %v4875_v45  ;;  %v4622_v14 = vmov 0   ;;  %v4263_v45 = vld [vmem:[#allocation8 + $0x280] ss:$16 sps:$4 sm:$0xff]   ;;  %v4298_v62 = vld [vmem:[#allocation8 + $0xec] ss:$16 sps:$4 sm:$0xff]  }
 0x2c3   :  { %v4911_v16 = vpack.c.bf16 %v1757_v5, %v1754_v3  ;;  %2493 = vmatpush1.bf16.msra.mxu1 %v4254_v52  ;;  %v4913_v23 = vpack.c.bf16 %v1739_v19, %v1736_v61  ;;  %v4296_v17 = vld [vmem:[#allocation8 + $0xe8] ss:$16 sps:$4 sm:$0xff]   ;;  %v4301_v53 = vld [vmem:[#allocation8 + $0x10c] ss:$16 sps:$4 sm:$0xff]  }
 0x2c4   :  { %v4915_v59 = vpack.c.bf16 %v1758_v7, %v1755_v58  ;;  %2494 = vmatprep.subr.bf16.mxu1 %v4259_v18  ;;  %v4917_v25 = vpack.c.bf16 %v1740_v9, %v1737_v60  ;;  %v4299_v43 = vld [vmem:[#allocation8 + $0x108] ss:$16 sps:$4 sm:$0xff]   ;;  %v4304_v54 = vld [vmem:[#allocation8 + $0x12c] ss:$16 sps:$4 sm:$0xff]  }
 0x2c5   :  { %2479 = vmatprep.mubr.bf16.mxu1 %v4911_v16  ;;  %v4302_v56 = vld [vmem:[#allocation8 + $0x128] ss:$16 sps:$4 sm:$0xff]   ;;  %v4310_v0 = vld [vmem:[#allocation8 + $0x16c] ss:$16 sps:$4 sm:$0xff]  }
 0x2c6   :  { %2480 = vmatmul.mubr.bf16.gmra.mrb[4].mxu1 %v4829_v10  ;;  %v4305_v20 = vld [vmem:[#allocation8 + $0x148] ss:$16 sps:$4 sm:$0xff]   ;;  %v4313_v36 = vld [vmem:[#allocation8 + $0x18c] ss:$16 sps:$4 sm:$0xff]  }
 0x2c7   :  { %2495 = vmatpush1.bf16.msra.mxu1 %v4257_v33  ;;  %2522 = vmatprep.mubr.bf16.mxu1 %v4622_v14  ;;  %v4308_v12 = vld [vmem:[#allocation8 + $0x168] ss:$16 sps:$4 sm:$0xff]   ;;  %v4316_v50 = vld [vmem:[#allocation8 + $0x1ac] ss:$16 sps:$4 sm:$0xff]  }
 0x2c8   :  { %2496 = vmatprep.subr.bf16.mxu1 %v4262_v38  ;;  %v4311_v2 = vld [vmem:[#allocation8 + $0x188] ss:$16 sps:$4 sm:$0xff]   ;;  %v4319_v55 = vld [vmem:[#allocation8 + $0x1cc] ss:$16 sps:$4 sm:$0xff]  }
 0x2c9   :  { %v4314_v24 = vld [vmem:[#allocation8 + $0x1a8] ss:$16 sps:$4 sm:$0xff]   ;;  %v4322_v3 = vld [vmem:[#allocation8 + $0x1ec] ss:$16 sps:$4 sm:$0xff]  }
 0x2ca   :  { %v4317_v61 = vld [vmem:[#allocation8 + $0x1c8] ss:$16 sps:$4 sm:$0xff]   ;;  %v4325_v52 = vld [vmem:[#allocation8 + $0x20c] ss:$16 sps:$4 sm:$0xff]  }
 0x2cb   :  { %2497 = vmatpush1.bf16.msra.mxu1 %v4260_v11  ;;  %v4320_v63 = vld [vmem:[#allocation8 + $0x1e8] ss:$16 sps:$4 sm:$0xff]   ;;  %v4328_v58 = vld [vmem:[#allocation8 + $0x22c] ss:$16 sps:$4 sm:$0xff]  }
 0x2cc   :  { %2498 = vmatprep.subr.bf16.mxu1 %v4265_v6  ;;  %v4323_v60 = vld [vmem:[#allocation8 + $0x208] ss:$16 sps:$4 sm:$0xff]   ;;  %v4331_v18 = vld [vmem:[#allocation8 + $0x24c] ss:$16 sps:$4 sm:$0xff]  }
 0x2cd   :  { %v4326_v4 = vld [vmem:[#allocation8 + $0x228] ss:$16 sps:$4 sm:$0xff]   ;;  %v4334_v5 = vld [vmem:[#allocation8 + $0x26c] ss:$16 sps:$4 sm:$0xff]  }
 0x2ce   :  { %v4329_v19 = vld [vmem:[#allocation8 + $0x248] ss:$16 sps:$4 sm:$0xff]   ;;  %v4337_v7 = vld [vmem:[#allocation8 + $0x28c] ss:$16 sps:$4 sm:$0xff]  }
 0x2cf   :  { %2499 = vmatpush1.bf16.msra.mxu1 %v4263_v45  ;;  %v4332_v9 = vld [vmem:[#allocation8 + $0x268] ss:$16 sps:$4 sm:$0xff]   ;;  %v4343_v38 = vld [vmem:[#allocation8 + $0x2cc] ss:$16 sps:$4 sm:$0xff]   ;;  %v4349_v45 = vld [vmem:[#allocation7 + $0x4] ss:$16 sps:$4 sm:$0xff]  }
 0x2d0   :  { %2500 = vmatprep.subr.bf16.mxu1 %v4268_v13  ;;  %v4338_v33 = vld [vmem:[#allocation8 + $0x2a8] ss:$16 sps:$4 sm:$0xff]   ;;  %v4346_v6 = vld [vmem:[#allocation8 + $0x2ec] ss:$16 sps:$4 sm:$0xff]   ;;  %v4347_v13 = vld [vmem:[#allocation7] ss:$16 sps:$4 sm:$0xff]  }
 0x2d1   :  { %v4341_v11 = vld [vmem:[#allocation8 + $0x2c8] ss:$16 sps:$4 sm:$0xff]  }
 0x2d3   :  { %2501 = vmatpush1.bf16.msra.mxu1 %v4266_v27  ;;  %v4352_v27 = vld [vmem:[#allocation7 + $0x24] ss:$16 sps:$4 sm:$0xff]  }
 0x2d4   :  { %2502 = vmatprep.subr.bf16.mxu1 %v4271_v29  ;;  %v4350_v29 = vld [vmem:[#allocation7 + $0x20] ss:$16 sps:$4 sm:$0xff]  }
 0x2d7   :  { %2503 = vmatpush1.bf16.msra.mxu1 %v4269_v31  ;;  %v4355_v31 = vld [vmem:[#allocation7 + $0x44] ss:$16 sps:$4 sm:$0xff]  }
 0x2d8   :  { %2504 = vmatprep.subr.bf16.mxu1 %v4274_v21  ;;  %v4353_v21 = vld [vmem:[#allocation7 + $0x40] ss:$16 sps:$4 sm:$0xff]  }
 0x2db   :  { %2505 = vmatpush1.bf16.msra.mxu1 %v4272_v32  ;;  %v4358_v32 = vld [vmem:[#allocation7 + $0x64] ss:$16 sps:$4 sm:$0xff]  }
 0x2dc   :  { %2543 = vmatprep.subr.bf16.mxu1 %v4277_v22  ;;  %v4356_v22 = vld [vmem:[#allocation7 + $0x60] ss:$16 sps:$4 sm:$0xff]  }
 0x2de   :  { %2523 = vmatmul.mubr.bf16.vlgmr.msra.gmra.mrb[0].mxu1 %v4899_v1 }
 0x2df   :  { %2544 = vmatpush1.bf16.msra.mxu1 %v4275_v35  ;;  %2532 = vmatprep.mubr.bf16.mxu1 %v4622_v14  ;;  %v4361_v35 = vld [vmem:[#allocation7 + $0x84] ss:$16 sps:$4 sm:$0xff]  }
 0x2e0   :  { %2545 = vmatprep.subr.bf16.mxu1 %v4280_v26  ;;  %v4364_v26 = vld [vmem:[#allocation7 + $0xa4] ss:$16 sps:$4 sm:$0xff]  }
 0x2e3   :  { %2546 = vmatpush1.bf16.msra.mxu1 %v4278_v37  ;;  %v4362_v37 = vld [vmem:[#allocation7 + $0xa0] ss:$16 sps:$4 sm:$0xff]  }
 0x2e4   :  { %2547 = vmatprep.subr.bf16.mxu1 %v4283_v39  ;;  %v4367_v39 = vld [vmem:[#allocation7 + $0xc4] ss:$16 sps:$4 sm:$0xff]  }
 0x2e6   :  { %2533 = vmatmul.mubr.bf16.gmra.mrb[4].mxu1 %v4915_v59 }
 0x2e7   :  { %2548 = vmatpush1.bf16.msra.mxu1 %v4281_v28  ;;  %2575 = vmatprep.mubr.bf16.mxu1 %v4893_v47  ;;  %v4307_v47 = vld [vmem:[#allocation8 + $0x14c] ss:$16 sps:$4 sm:$0xff]   ;;  %v4365_v28 = vld [vmem:[#allocation7 + $0xc0] ss:$16 sps:$4 sm:$0xff]  }
 0x2e8   :  { %2549 = vmatprep.subr.bf16.mxu1 %v4286_v30  ;;  %v4370_v30 = vld [vmem:[#allocation7 + $0xe4] ss:$16 sps:$4 sm:$0xff]  }
 0x2eb   :  { %2550 = vmatpush1.bf16.msra.mxu1 %v4284_v41  ;;  %v4373_v41 = vld [vmem:[#allocation7 + $0x104] ss:$16 sps:$4 sm:$0xff]  }
 0x2ec   :  { %2551 = vmatprep.subr.bf16.mxu1 %v4289_v8  ;;  %v4371_v8 = vld [vmem:[#allocation7 + $0x100] ss:$16 sps:$4 sm:$0xff]  }
 0x2ef   :  { %2552 = vmatpush1.bf16.msra.mxu1 %v4287_v44  ;;  %v4376_v44 = vld [vmem:[#allocation7 + $0x124] ss:$16 sps:$4 sm:$0xff]  }
 0x2f0   :  { %2553 = vmatprep.subr.bf16.mxu1 %v4292_v46  ;;  %v4374_v46 = vld [vmem:[#allocation7 + $0x120] ss:$16 sps:$4 sm:$0xff]  }
 0x2f3   :  { %2554 = vmatpush1.bf16.msra.mxu1 %v4290_v48  ;;  %v4379_v48 = vld [vmem:[#allocation7 + $0x144] ss:$16 sps:$4 sm:$0xff]  }
 0x2f4   :  { %2555 = vmatprep.subr.bf16.mxu1 %v4295_v51  ;;  %v4377_v51 = vld [vmem:[#allocation7 + $0x140] ss:$16 sps:$4 sm:$0xff]  }
 0x2f7   :  { %2556 = vmatpush1.bf16.msra.mxu1 %v4293_v34  ;;  %v4382_v34 = vld [vmem:[#allocation7 + $0x164] ss:$16 sps:$4 sm:$0xff]  }
 0x2f8   :  { %2557 = vmatprep.subr.bf16.mxu1 %v4298_v62  ;;  %v4380_v62 = vld [vmem:[#allocation7 + $0x160] ss:$16 sps:$4 sm:$0xff]  }
 0x2fb   :  { %2558 = vmatpush1.bf16.msra.mxu1 %v4296_v17  ;;  %v4385_v17 = vld [vmem:[#allocation7 + $0x184] ss:$16 sps:$4 sm:$0xff]  }
 0x2fc   :  { %2559 = vmatprep.subr.bf16.mxu1 %v4301_v53  ;;  %v4383_v53 = vld [vmem:[#allocation7 + $0x180] ss:$16 sps:$4 sm:$0xff]  }
 0x2ff   :  { %2560 = vmatpush1.bf16.msra.mxu1 %v4299_v43  ;;  %v4388_v43 = vld [vmem:[#allocation7 + $0x1a4] ss:$16 sps:$4 sm:$0xff]  }
 0x300   :  { %2561 = vmatprep.subr.bf16.mxu1 %v4304_v54  ;;  %v4386_v54 = vld [vmem:[#allocation7 + $0x1a0] ss:$16 sps:$4 sm:$0xff]  }
 0x303   :  { %2562 = vmatpush1.bf16.msra.mxu1 %v4302_v56  ;;  %v4391_v56 = vld [vmem:[#allocation7 + $0x1c4] ss:$16 sps:$4 sm:$0xff]  }
 0x304   :  { %2563 = vmatprep.subr.bf16.mxu1 %v4307_v47  ;;  %v4389_v47 = vld [vmem:[#allocation7 + $0x1c0] ss:$16 sps:$4 sm:$0xff]  }
 0x307   :  { %2564 = vmatpush1.bf16.msra.mxu1 %v4305_v20  ;;  %v4394_v20 = vld [vmem:[#allocation7 + $0x1e4] ss:$16 sps:$4 sm:$0xff]  }
 0x308   :  { %2565 = vmatprep.subr.bf16.mxu1 %v4310_v0  ;;  %v4392_v0 = vld [vmem:[#allocation7 + $0x1e0] ss:$16 sps:$4 sm:$0xff]  }
 0x30b   :  { %2566 = vmatpush1.bf16.msra.mxu1 %v4308_v12  ;;  %v4397_v12 = vld [vmem:[#allocation7 + $0x204] ss:$16 sps:$4 sm:$0xff]  }
 0x30c   :  { %2567 = vmatprep.subr.bf16.mxu1 %v4313_v36  ;;  %v4395_v36 = vld [vmem:[#allocation7 + $0x200] ss:$16 sps:$4 sm:$0xff]  }
 0x30f   :  { %2568 = vmatpush1.bf16.msra.mxu1 %v4311_v2  ;;  %v4400_v2 = vld [vmem:[#allocation7 + $0x224] ss:$16 sps:$4 sm:$0xff]  }
 0x310   :  { %2569 = vmatprep.subr.bf16.mxu1 %v4316_v50  ;;  %v4398_v50 = vld [vmem:[#allocation7 + $0x220] ss:$16 sps:$4 sm:$0xff]  }
 0x313   :  { %2570 = vmatpush1.bf16.msra.mxu1 %v4314_v24  ;;  %v4403_v24 = vld [vmem:[#allocation7 + $0x244] ss:$16 sps:$4 sm:$0xff]  }
 0x314   :  { %2571 = vmatprep.subr.bf16.mxu1 %v4319_v55  ;;  %v4401_v55 = vld [vmem:[#allocation7 + $0x240] ss:$16 sps:$4 sm:$0xff]  }
 0x317   :  { %2572 = vmatpush1.bf16.msra.mxu1 %v4317_v61  ;;  %v4406_v61 = vld [vmem:[#allocation7 + $0x264] ss:$16 sps:$4 sm:$0xff]  }
 0x318   :  { %2573 = vmatprep.subr.bf16.mxu1 %v4322_v3  ;;  %v4404_v3 = vld [vmem:[#allocation7 + $0x260] ss:$16 sps:$4 sm:$0xff]  }
 0x31b   :  { %2574 = vmatpush1.bf16.msra.mxu1 %v4320_v63  ;;  %v4409_v63 = vld [vmem:[#allocation7 + $0x284] ss:$16 sps:$4 sm:$0xff]  }
 0x31c   :  { %2596 = vmatprep.subr.bf16.mxu1 %v4325_v52  ;;  %v4407_v52 = vld [vmem:[#allocation7 + $0x280] ss:$16 sps:$4 sm:$0xff]  }
 0x31e   :  { %2576 = vmatmul.mubr.bf16.vlgmr.msra.gmra.mrb[8].mxu1 %v4824_v57  ;;  %v4335_v57 = vld [vmem:[#allocation8 + $0x288] ss:$16 sps:$4 sm:$0xff]  }
 0x31f   :  { %2585 = vmatprep.mubr.bf16.mxu1 %v4911_v16  ;;  %2597 = vmatpush1.bf16.msra.mxu1 %v4323_v60  ;;  %v4340_v16 = vld [vmem:[#allocation8 + $0x2ac] ss:$16 sps:$4 sm:$0xff]   ;;  %v4412_v60 = vld [vmem:[#allocation7 + $0x2a4] ss:$16 sps:$4 sm:$0xff]  }
 0x320   :  { %2598 = vmatprep.subr.bf16.mxu1 %v4328_v58  ;;  %v4410_v58 = vld [vmem:[#allocation7 + $0x2a0] ss:$16 sps:$4 sm:$0xff]  }
 0x323   :  { %2599 = vmatpush1.bf16.msra.mxu1 %v4326_v4  ;;  %v4415_v4 = vld [vmem:[#allocation7 + $0x2c4] ss:$16 sps:$4 sm:$0xff]  }
 0x324   :  { %2600 = vmatprep.subr.bf16.mxu1 %v4331_v18  ;;  %v4413_v18 = vld [vmem:[#allocation7 + $0x2c0] ss:$16 sps:$4 sm:$0xff]  }
 0x326   :  { %2586 = vmatmul.mubr.bf16.gmra.mrb[12].mxu1 %v4829_v10  ;;  %v4344_v10 = vld [vmem:[#allocation8 + $0x2e8] ss:$16 sps:$4 sm:$0xff]  }
 0x327   :  { %2601 = vmatpush1.bf16.msra.mxu1 %v4329_v19  ;;  %2628 = vmatprep.mubr.bf16.mxu1 %v4622_v14  ;;  %v4418_v19 = vld [vmem:[#allocation7 + $0x2e4] ss:$16 sps:$4 sm:$0xff]  }
 0x328   :  { %2602 = vmatprep.subr.bf16.mxu1 %v4334_v5  ;;  %v4416_v5 = vld [vmem:[#allocation7 + $0x2e0] ss:$16 sps:$4 sm:$0xff]  }
 0x32b   :  { %2603 = vmatpush1.bf16.msra.mxu1 %v4332_v9  ;;  %v4421_v9 = vld [vmem:[#allocation7 + $0xc] ss:$16 sps:$4 sm:$0xff]  }
 0x32c   :  { %2604 = vmatprep.subr.bf16.mxu1 %v4337_v7  ;;  %v4419_v7 = vld [vmem:[#allocation7 + $0x8] ss:$16 sps:$4 sm:$0xff]  }
 0x32f   :  { %2605 = vmatpush1.bf16.msra.mxu1 %v4335_v57  ;;  %v4424_v57 = vld [vmem:[#allocation7 + $0x2c] ss:$16 sps:$4 sm:$0xff]  }
 0x330   :  { %2606 = vmatprep.subr.bf16.mxu1 %v4340_v16  ;;  %v4422_v16 = vld [vmem:[#allocation7 + $0x28] ss:$16 sps:$4 sm:$0xff]  }
 0x333   :  { %2607 = vmatpush1.bf16.msra.mxu1 %v4338_v33  ;;  %v4427_v33 = vld [vmem:[#allocation7 + $0x4c] ss:$16 sps:$4 sm:$0xff]  }
 0x334   :  { %2608 = vmatprep.subr.bf16.mxu1 %v4343_v38  ;;  %v4425_v38 = vld [vmem:[#allocation7 + $0x48] ss:$16 sps:$4 sm:$0xff]  }
 0x337   :  { %2609 = vmatpush1.bf16.msra.mxu1 %v4341_v11  ;;  %v4430_v11 = vld [vmem:[#allocation7 + $0x6c] ss:$16 sps:$4 sm:$0xff]  }
 0x338   :  { %2610 = vmatprep.subr.bf16.mxu1 %v4346_v6  ;;  %v4428_v6 = vld [vmem:[#allocation7 + $0x68] ss:$16 sps:$4 sm:$0xff]  }
 0x33b   :  { %2611 = vmatpush1.bf16.msra.mxu1 %v4344_v10  ;;  %v4433_v10 = vld [vmem:[#allocation7 + $0x8c] ss:$16 sps:$4 sm:$0xff]  }
 0x33c   :  { %3129 = vmatprep.subr.bf16.mxu1 %v4349_v45  ;;  %v4431_v45 = vld [vmem:[#allocation7 + $0x88] ss:$16 sps:$4 sm:$0xff]  }
 0x33e   :  { %2629 = vmatmul.mubr.bf16.vlgmr.msra.gmra.mrb[8].mxu1 %v4899_v1  ;;  %v4359_v1 = vld [vmem:[#allocation7 + $0x80] ss:$16 sps:$4 sm:$0xff]  }
 0x33f   :  { %3130 = vmatpush1.bf16.msra.mxu1 %v4347_v13  ;;  %2638 = vmatprep.mubr.bf16.mxu1 %v4622_v14  ;;  %v4436_v13 = vld [vmem:[#allocation7 + $0xac] ss:$16 sps:$4 sm:$0xff]  }
 0x340   :  { %3131 = vmatprep.subr.bf16.mxu1 %v4352_v27  ;;  %v4434_v27 = vld [vmem:[#allocation7 + $0xa8] ss:$16 sps:$4 sm:$0xff]  }
 0x343   :  { %3132 = vmatpush1.bf16.msra.mxu1 %v4350_v29  ;;  %v4439_v29 = vld [vmem:[#allocation7 + $0xcc] ss:$16 sps:$4 sm:$0xff]  }
 0x344   :  { %3133 = vmatprep.subr.bf16.mxu1 %v4355_v31  ;;  %v4437_v31 = vld [vmem:[#allocation7 + $0xc8] ss:$16 sps:$4 sm:$0xff]  }
 0x346   :  { %2639 = vmatmul.mubr.bf16.gmra.mrb[12].mxu1 %v4915_v59  ;;  %v4368_v59 = vld [vmem:[#allocation7 + $0xe0] ss:$16 sps:$4 sm:$0xff]  }
 0x347   :  { %3134 = vmatpush1.bf16.msra.mxu1 %v4353_v21  ;;  %3161 = vmatprep.mubr.bf16.mxu1 %v4895_v42  ;;  %v4442_v21 = vld [vmem:[#allocation7 + $0xec] ss:$16 sps:$4 sm:$0xff]  }
 0x348   :  { %3135 = vmatprep.subr.bf16.mxu1 %v4358_v32  ;;  %v4440_v32 = vld [vmem:[#allocation7 + $0xe8] ss:$16 sps:$4 sm:$0xff]  }
 0x34b   :  { %3136 = vmatpush1.bf16.msra.mxu1 %v4356_v22  ;;  %v4445_v22 = vld [vmem:[#allocation7 + $0x10c] ss:$16 sps:$4 sm:$0xff]  }
 0x34c   :  { %3137 = vmatprep.subr.bf16.mxu1 %v4361_v35  ;;  %v4448_v35 = vld [vmem:[#allocation7 + $0x12c] ss:$16 sps:$4 sm:$0xff]  }
 0x34f   :  { %3138 = vmatpush1.bf16.msra.mxu1 %v4359_v1  ;;  %v4446_v1 = vld [vmem:[#allocation7 + $0x128] ss:$16 sps:$4 sm:$0xff]  }
 0x350   :  { %3139 = vmatprep.subr.bf16.mxu1 %v4364_v26  ;;  %v4451_v26 = vld [vmem:[#allocation7 + $0x14c] ss:$16 sps:$4 sm:$0xff]  }
 0x353   :  { %3140 = vmatpush1.bf16.msra.mxu1 %v4362_v37  ;;  %v4449_v37 = vld [vmem:[#allocation7 + $0x148] ss:$16 sps:$4 sm:$0xff]  }
 0x354   :  { %3141 = vmatprep.subr.bf16.mxu1 %v4367_v39  ;;  %v4454_v39 = vld [vmem:[#allocation7 + $0x16c] ss:$16 sps:$4 sm:$0xff]  }
 0x357   :  { %3142 = vmatpush1.bf16.msra.mxu1 %v4365_v28  ;;  %v4452_v28 = vld [vmem:[#allocation7 + $0x168] ss:$16 sps:$4 sm:$0xff]  }
 0x358   :  { %3143 = vmatprep.subr.bf16.mxu1 %v4370_v30  ;;  %v4457_v30 = vld [vmem:[#allocation7 + $0x18c] ss:$16 sps:$4 sm:$0xff]  }
 0x35b   :  { %3144 = vmatpush1.bf16.msra.mxu1 %v4368_v59  ;;  %v4455_v59 = vld [vmem:[#allocation7 + $0x188] ss:$16 sps:$4 sm:$0xff]  }
 0x35c   :  { %3145 = vmatprep.subr.bf16.mxu1 %v4373_v41  ;;  %v4460_v41 = vld [vmem:[#allocation7 + $0x1ac] ss:$16 sps:$4 sm:$0xff]  }
 0x35f   :  { %3146 = vmatpush1.bf16.msra.mxu1 %v4371_v8  ;;  %v4458_v8 = vld [vmem:[#allocation7 + $0x1a8] ss:$16 sps:$4 sm:$0xff]  }
 0x360   :  { %3147 = vmatprep.subr.bf16.mxu1 %v4376_v44  ;;  %v4463_v44 = vld [vmem:[#allocation7 + $0x1cc] ss:$16 sps:$4 sm:$0xff]  }
 0x363   :  { %3148 = vmatpush1.bf16.msra.mxu1 %v4374_v46  ;;  %v4461_v46 = vld [vmem:[#allocation7 + $0x1c8] ss:$16 sps:$4 sm:$0xff]  }
 0x364   :  { %3149 = vmatprep.subr.bf16.mxu1 %v4379_v48  ;;  %v4466_v48 = vld [vmem:[#allocation7 + $0x1ec] ss:$16 sps:$4 sm:$0xff]  }
 0x367   :  { %3150 = vmatpush1.bf16.msra.mxu1 %v4377_v51  ;;  %v4464_v51 = vld [vmem:[#allocation7 + $0x1e8] ss:$16 sps:$4 sm:$0xff]  }
 0x368   :  { %3151 = vmatprep.subr.bf16.mxu1 %v4382_v34  ;;  %v4469_v34 = vld [vmem:[#allocation7 + $0x20c] ss:$16 sps:$4 sm:$0xff]  }
 0x36b   :  { %3152 = vmatpush1.bf16.msra.mxu1 %v4380_v62  ;;  %v4467_v62 = vld [vmem:[#allocation7 + $0x208] ss:$16 sps:$4 sm:$0xff]  }
 0x36c   :  { %3153 = vmatprep.subr.bf16.mxu1 %v4385_v17  ;;  %v4472_v17 = vld [vmem:[#allocation7 + $0x22c] ss:$16 sps:$4 sm:$0xff]  }
 0x36f   :  { %3154 = vmatpush1.bf16.msra.mxu1 %v4383_v53  ;;  %v4470_v53 = vld [vmem:[#allocation7 + $0x228] ss:$16 sps:$4 sm:$0xff]  }
 0x370   :  { %3155 = vmatprep.subr.bf16.mxu1 %v4388_v43  ;;  %v4475_v43 = vld [vmem:[#allocation7 + $0x24c] ss:$16 sps:$4 sm:$0xff]  }
 0x373   :  { %3156 = vmatpush1.bf16.msra.mxu1 %v4386_v54  ;;  %v4473_v54 = vld [vmem:[#allocation7 + $0x248] ss:$16 sps:$4 sm:$0xff]  }
 0x374   :  { %3157 = vmatprep.subr.bf16.mxu1 %v4391_v56  ;;  %v4478_v56 = vld [vmem:[#allocation7 + $0x26c] ss:$16 sps:$4 sm:$0xff]  }
 0x377   :  { %3158 = vmatpush1.bf16.msra.mxu1 %v4389_v47  ;;  %v4476_v47 = vld [vmem:[#allocation7 + $0x268] ss:$16 sps:$4 sm:$0xff]  }
 0x378   :  { %3159 = vmatprep.subr.bf16.mxu1 %v4394_v20  ;;  %v4481_v20 = vld [vmem:[#allocation7 + $0x28c] ss:$16 sps:$4 sm:$0xff]  }
 0x37b   :  { %3160 = vmatpush1.bf16.msra.mxu1 %v4392_v0  ;;  %v4482_v0 = vld [vmem:[#allocation7 + $0x2a8] ss:$16 sps:$4 sm:$0xff]  }
 0x37c   :  { %3182 = vmatprep.subr.bf16.mxu1 %v4397_v12  ;;  %v4487_v12 = vld [vmem:[#allocation7 + $0x2cc] ss:$16 sps:$4 sm:$0xff]  }
 0x37e   :  { %3162 = vmatmul.mubr.bf16.vlgmr.msra.gmra.mrb[0].mxu1 %v4822_v40 }
 0x37f   :  { %3171 = vmatprep.mubr.bf16.mxu1 %v4913_v23  ;;  %3183 = vmatpush1.bf16.msra.mxu1 %v4395_v36  ;;  %v4485_v36 = vld [vmem:[#allocation7 + $0x2c8] ss:$16 sps:$4 sm:$0xff]  }
 0x380   :  { %3184 = vmatprep.subr.bf16.mxu1 %v4400_v2  ;;  %v4490_v2 = vld [vmem:[#allocation7 + $0x2ec] ss:$16 sps:$4 sm:$0xff]  }
 0x383   :  { %3185 = vmatpush1.bf16.msra.mxu1 %v4398_v50 }
 0x384   :  { %3186 = vmatprep.subr.bf16.mxu1 %v4403_v24 }
 0x386   :  { %3172 = vmatmul.mubr.bf16.gmra.mrb[4].mxu1 %v4831_v15 }
 0x387   :  { %3187 = vmatpush1.bf16.msra.mxu1 %v4401_v55  ;;  %3214 = vmatprep.mubr.bf16.mxu1 %v4622_v14 }
 0x388   :  { %3188 = vmatprep.subr.bf16.mxu1 %v4406_v61 }
 0x38b   :  { %3189 = vmatpush1.bf16.msra.mxu1 %v4404_v3 }
 0x38c   :  { %3190 = vmatprep.subr.bf16.mxu1 %v4409_v63 }
 0x38f   :  { %3191 = vmatpush1.bf16.msra.mxu1 %v4407_v52 }
 0x390   :  { %3192 = vmatprep.subr.bf16.mxu1 %v4412_v60 }
 0x393   :  { %3193 = vmatpush1.bf16.msra.mxu1 %v4410_v58 }
 0x394   :  { %3194 = vmatprep.subr.bf16.mxu1 %v4415_v4 }
 0x397   :  { %3195 = vmatpush1.bf16.msra.mxu1 %v4413_v18 }
 0x398   :  { %3196 = vmatprep.subr.bf16.mxu1 %v4418_v19 }
 0x39b   :  { %3197 = vmatpush1.bf16.msra.mxu1 %v4416_v5 }
 0x39c   :  { %3235 = vmatprep.subr.bf16.mxu1 %v4421_v9 }
 0x39e   :  { %3215 = vmatmul.mubr.bf16.vlgmr.msra.gmra.mrb[0].mxu1 %v4897_v49 }
 0x39f   :  { %3236 = vmatpush1.bf16.msra.mxu1 %v4419_v7  ;;  %3224 = vmatprep.mubr.bf16.mxu1 %v4622_v14 }
 0x3a0   :  { %3237 = vmatprep.subr.bf16.mxu1 %v4424_v57 }
 0x3a3   :  { %3238 = vmatpush1.bf16.msra.mxu1 %v4422_v16 }
 0x3a4   :  { %3239 = vmatprep.subr.bf16.mxu1 %v4427_v33 }
 0x3a6   :  { %3225 = vmatmul.mubr.bf16.gmra.mrb[4].mxu1 %v4917_v25 }
 0x3a7   :  { %3240 = vmatpush1.bf16.msra.mxu1 %v4425_v38  ;;  %3267 = vmatprep.mubr.bf16.mxu1 %v4895_v42  ;;  %v4443_v42 = vld [vmem:[#allocation7 + $0x108] ss:$16 sps:$4 sm:$0xff]  }
 0x3a8   :  { %3241 = vmatprep.subr.bf16.mxu1 %v4430_v11 }
 0x3ab   :  { %3242 = vmatpush1.bf16.msra.mxu1 %v4428_v6 }
 0x3ac   :  { %3243 = vmatprep.subr.bf16.mxu1 %v4433_v10 }
 0x3af   :  { %3244 = vmatpush1.bf16.msra.mxu1 %v4431_v45 }
 0x3b0   :  { %3245 = vmatprep.subr.bf16.mxu1 %v4436_v13 }
 0x3b3   :  { %3246 = vmatpush1.bf16.msra.mxu1 %v4434_v27 }
 0x3b4   :  { %3247 = vmatprep.subr.bf16.mxu1 %v4439_v29 }
 0x3b7   :  { %3248 = vmatpush1.bf16.msra.mxu1 %v4437_v31 }
 0x3b8   :  { %3249 = vmatprep.subr.bf16.mxu1 %v4442_v21 }
 0x3bb   :  { %3250 = vmatpush1.bf16.msra.mxu1 %v4440_v32 }
 0x3bc   :  { %3251 = vmatprep.subr.bf16.mxu1 %v4445_v22 }
 0x3bf   :  { %3252 = vmatpush1.bf16.msra.mxu1 %v4443_v42 }
 0x3c0   :  { %3253 = vmatprep.subr.bf16.mxu1 %v4448_v35 }
 0x3c3   :  { %3254 = vmatpush1.bf16.msra.mxu1 %v4446_v1  ;;  %v3341_v1 = vld [vmem:[%s4991_s6] sm:$0xff] }
 0x3c4   :  { %3255 = vmatprep.subr.bf16.mxu1 %v4451_v26 }
 0x3c7   :  { %3256 = vmatpush1.bf16.msra.mxu1 %v4449_v37 }
 0x3c8   :  { %3257 = vmatprep.subr.bf16.mxu1 %v4454_v39 }
 0x3cb   :  { %3258 = vmatpush1.bf16.msra.mxu1 %v4452_v28 }
 0x3cc   :  { %3259 = vmatprep.subr.bf16.mxu1 %v4457_v30 }
 0x3cf   :  { %3260 = vmatpush1.bf16.msra.mxu1 %v4455_v59 }
 0x3d0   :  { %3261 = vmatprep.subr.bf16.mxu1 %v4460_v41  ;;  %v3342_v41 = vld [vmem:[%s4991_s6 + $0x8] sm:$0xf] }
 0x3d3   :  { %3262 = vmatpush1.bf16.msra.mxu1 %v4458_v8 }
 0x3d4   :  { %3263 = vmatprep.subr.bf16.mxu1 %v4463_v44 }
 0x3d7   :  { %3264 = vmatpush1.bf16.msra.mxu1 %v4461_v46 }
 0x3d8   :  { %3265 = vmatprep.subr.bf16.mxu1 %v4466_v48 }
 0x3db   :  { %3266 = vmatpush1.bf16.msra.mxu1 %v4464_v51 }
 0x3dc   :  { %3288 = vmatprep.subr.bf16.mxu1 %v4469_v34 }
 0x3de   :  { %3268 = vmatmul.mubr.bf16.vlgmr.msra.gmra.mrb[8].mxu1 %v4822_v40  ;;  %v4479_v40 = vld [vmem:[#allocation7 + $0x288] ss:$16 sps:$4 sm:$0xff]  }
 0x3df   :  { %3277 = vmatprep.mubr.bf16.mxu1 %v4913_v23  ;;  %3289 = vmatpush1.bf16.msra.mxu1 %v4467_v62  ;;  %v4484_v23 = vld [vmem:[#allocation7 + $0x2ac] ss:$16 sps:$4 sm:$0xff]  }
 0x3e0   :  { %3290 = vmatprep.subr.bf16.mxu1 %v4472_v17 }
 0x3e3   :  { %3291 = vmatpush1.bf16.msra.mxu1 %v4470_v53 }
 0x3e4   :  { %3292 = vmatprep.subr.bf16.mxu1 %v4475_v43 }
 0x3e6   :  { %3278 = vmatmul.mubr.bf16.gmra.mrb[12].mxu1 %v4831_v15  ;;  %v4488_v15 = vld [vmem:[#allocation7 + $0x2e8] ss:$16 sps:$4 sm:$0xff]  }
 0x3e7   :  { %3293 = vmatpush1.bf16.msra.mxu1 %v4473_v54  ;;  %3320 = vmatprep.mubr.bf16.mxu1 %v4622_v14 }
 0x3e8   :  { %3294 = vmatprep.subr.bf16.mxu1 %v4478_v56 }
 0x3eb   :  { %3295 = vmatpush1.bf16.msra.mxu1 %v4476_v47 }
 0x3ec   :  { %3296 = vmatprep.subr.bf16.mxu1 %v4481_v20 }
 0x3ef   :  { %3297 = vmatpush1.bf16.msra.mxu1 %v4479_v40 }
 0x3f0   :  { %3298 = vmatprep.subr.bf16.mxu1 %v4484_v23 }
 0x3f3   :  { %3299 = vmatpush1.bf16.msra.mxu1 %v4482_v0 }
 0x3f4   :  { %3300 = vmatprep.subr.bf16.mxu1 %v4487_v12 }
 0x3f7   :  { %3301 = vmatpush1.bf16.msra.mxu1 %v4485_v36 }
 0x3f8   :  { %3302 = vmatprep.subr.bf16.mxu1 %v4490_v2 }
 0x3fb   :  { %3303 = vmatpush1.bf16.msra.mxu1 %v4488_v15 }
 0x3fe   :  { %3321 = vmatmul.mubr.bf16.vlgmr.msra.gmra.mrb[8].mxu1 %v4897_v49 }
 0x3ff   :  { %3330 = vmatprep.mubr.bf16.mxu1 %v4622_v14 }
 0x406   :  { %3331 = vmatmul.mubr.bf16.gmra.mrb[12].mxu1 %v4917_v25 }
 0x471   :  { %v3216_v50 = vpop.f32.mrb[0].mxu1 }
 0x472   :  { %v3218_v24 = vpop.f32.mrb[1].mxu1 }
 0x473   :  { %v3347_v55 = vrot.slane %v3218_v24, 7  ;;  %v3220_v61 = vpop.f32.mrb[2].mxu1 }
 0x474   :  { %v3222_v3 = vpop.f32.mrb[3].mxu1  ;;  %v3344_v4 = vsel %vm3343_vm0, %v3220_v61, 0.0 }
 0x475   :  { %v3352_v63 = vsel %vm3343_vm0, 0.0, %v3347_v55  ;;  %v3348_v52 = vrot.slane %v3222_v3, 7 }
 0x476   :  { %v3355_v60 = vadd.f32 %v3352_v63, %v3216_v50 }
 0x477   :  { %v3349_v58 = vsel %vm3343_vm0, %v3347_v55, %v3348_v52 }
 0x478   :  { %v3354_v49 = vsel %vm3353_vm1, %v3349_v58, 0.0 }
 0x479   :  { %v3356_v14 = vadd.f32 %v3354_v49, %v3344_v4  ;;  %v3226_v18 = vpop.f32.mrb[4].mxu1 }
 0x47a   :  { %v3228_v25 = vpop.f32.mrb[5].mxu1 }
 0x47b   :  { %v3386_v19 = vrot.slane %v3228_v25, 7  ;;  %v3230_v5 = vpop.f32.mrb[6].mxu1 }
 0x47c   :  { %v3232_v9 = vpop.f32.mrb[7].mxu1  ;;  %v3383_v38 = vsel %vm3343_vm0, %v3230_v5, 0.0 }
 0x47d   :  { %v3391_v7 = vsel %vm3343_vm0, 0.0, %v3386_v19  ;;  %v3387_v57 = vrot.slane %v3232_v9, 7 }
 0x47e   :  { %v3393_v16 = vadd.f32 %v3391_v7, %v3226_v18 }
 0x47f   :  { %v3388_v33 = vsel %vm3343_vm0, %v3386_v19, %v3387_v57 }
 0x480   :  { %v3392_v11 = vsel %vm3353_vm1, %v3388_v33, 0.0 }
 0x481   :  { %v3394_v6 = vadd.f32 %v3392_v11, %v3383_v38 }
 0x4d1   :  { %v3322_v10 = vpop.f32.mrb[8].mxu1 }
 0x4d2   :  { %v3359_v45 = vrot.slane %v3322_v10, 6  ;;  %v3324_v13 = vpop.f32.mrb[9].mxu1 }
 0x4d3   :  { %v3371_v27 = vrot.slane %v3324_v13, 5  ;;  %v3326_v29 = vpop.f32.mrb[10].mxu1 }
 0x4d4   :  { %v3364_v31 = vsel %vm3353_vm1, 0.0, %v3359_v45  ;;  %v3360_v21 = vrot.slane %v3326_v29, 6  ;;  %v3328_v32 = vpop.f32.mrb[11].mxu1 }
 0x4d5   :  { %v3367_v22 = vadd.f32 %v3364_v31, %v3355_v60  ;;  %v3376_v42 = vsel %vm3365_vm2, 0.0, %v3371_v27  ;;  %v3372_v35 = vrot.slane %v3328_v32, 5 }
 0x4d6   :  { %v3361_v26 = vsel %vm3353_vm1, %v3359_v45, %v3360_v21 }
 0x4d7   :  { %v3377_v37 = vadd.f32 %v3376_v42, %v3367_v22  ;;  %v3366_v39 = vsel %vm3365_vm2, %v3361_v26, 0.0  ;;  %v3373_v28 = vsel %vm3365_vm2, %v3371_v27, %v3372_v35 }
 0x4d8   :  { %v3368_v30 = vadd.f32 %v3366_v39, %v3356_v14 }
 0x4d9   :  { %v3379_v59 = vmul.f32 %v3377_v37, %v3341_v1  ;;  %v3332_v8 = vpop.f32.mrb[12].mxu1 }
 0x4da   :  { %v3378_v44 = vadd.f32 %v3373_v28, %v3368_v30  ;;  %v3397_v46 = vrot.slane %v3332_v8, 6  ;;  %v3334_v48 = vpop.f32.mrb[13].mxu1 }
 0x4db   :  { %3381 = vst [vmem:[%s4992_s7] sm:$0xff] %v3379_v59  ;;  %v3408_v51 = vrot.slane %v3334_v48, 5  ;;  %v3336_v34 = vpop.f32.mrb[14].mxu1 }
 0x4dc   :  { %v3380_v62 = vmul.f32 %v3378_v44, %v3342_v41  ;;  %v3402_v17 = vsel %vm3353_vm1, 0.0, %v3397_v46  ;;  %v3398_v53 = vrot.slane %v3336_v34, 6  ;;  %v3338_v43 = vpop.f32.mrb[15].mxu1 }
 0x4dd   :  { %v3404_v54 = vadd.f32 %v3402_v17, %v3393_v16  ;;  %v3413_v56 = vsel %vm3365_vm2, 0.0, %v3408_v51  ;;  %v3409_v47 = vrot.slane %v3338_v43, 5 }
 0x4de   :  { %3382 = vst [vmem:[%s4992_s7 + $0x8] sm:$0xf] %v3380_v62  ;;  %v3399_v20 = vsel %vm3353_vm1, %v3397_v46, %v3398_v53 }
 0x4df   :  { %v3414_v40 = vadd.f32 %v3413_v56, %v3404_v54  ;;  %v3403_v23 = vsel %vm3365_vm2, %v3399_v20, 0.0  ;;  %v3410_v0 = vsel %vm3365_vm2, %v3408_v51, %v3409_v47 }
 0x4e0   :  { %v3405_v12 = vadd.f32 %v3403_v23, %v3394_v6 }
 0x4e1   :  { %v3416_v36 = vmul.f32 %v3414_v40, %v3341_v1 }
 0x4e2   :  { %v3415_v2 = vadd.f32 %v3410_v0, %v3405_v12 }
 0x4e3   :  { %3820 = vst [vmem:[%s4992_s7 + $0x10] sm:$0xff] %v3416_v36 }
 0x4e4   :  { %v3417_v15 = vmul.f32 %v3415_v2, %v3342_v41 }
 0x4e6   :  { %3821 = vst [vmem:[%s4992_s7 + $0x18] sm:$0xf] %v3417_v15 }
 0x4e7   :  { %3425 = vsyncpa [#allocation4], 1 }
 0x4e8   :  { %3426 = vsyncpa [#allocation6], 1 }
 0x4e9   :  { %3427 = vsyncpa [#allocation9], 1 }

</bundles_post_ra>
